<compile_context>
chip_gen: v7x
topology: tpu7x:2x2x1
jax: 0.10.0
libtpu: 0.0.40
codegen_flags: <defaults>
</compile_context>

<pallas_src>
import functools
import math

import jax
import jax.numpy as jnp
from jax import lax
from jax.experimental import pallas as pl
from jax.experimental.pallas import tpu as pltpu

EPS = 1e-5
NEG_SLOPE = 0.01
K = 3      # ConvLayer is a fixed 3x3 conv
PAD = 1    # padding=1 ("same")


def _conv_moments_kernel(x_ref, w_ref, y_ref, mom_ref, xpad_ref, *,
                         H, W, Cin, Cout):
    """Fused 3x3 conv (bias-free), lane-dense output + streamed BN moments.

    x_ref   : (1, Cin, H, W)      NCHW input block (one image), f32
    w_ref   : (Cout, K*K*Cin)     flattened weights, bf16 (MXU lhs)
    y_ref   : (1, Cout, H*W)      pre-BN conv output block, bf16 (lane-dense)
    mom_ref : (1, Cout, 2)        per-image [sum, sum_of_squares] over H*W, f32
    xpad_ref: (Cin, H+2, W+2)     bf16 VMEM scratch holding the padded image
    """
    dt = xpad_ref.dtype

    # Zero only the 4 halo strips (interior is fully overwritten below).  This
    # is done every step so it stays correct when the batch axis is sharded
    # across TensorCores ("parallel" semantics) — each core's scratch is halo-
    # clean regardless of which grid indices it executes.
    zrow = jnp.zeros((Cin, PAD, W + 2 * PAD), dt)
    zcol = jnp.zeros((Cin, H + 2 * PAD, PAD), dt)
    xpad_ref[:, :PAD, :] = zrow
    xpad_ref[:, H + PAD:, :] = zrow
    xpad_ref[:, :, :PAD] = zcol
    xpad_ref[:, :, W + PAD:] = zcol

    # Interior: cast to bf16 once on store (MXU operand precision).
    xpad_ref[:, PAD:PAD + H, PAD:PAD + W] = x_ref[0].astype(dt)

    # im2col, transposed: (9*Cin, H*W) so the matmul result (Cout, H*W) is
    # lane-dense and already in NCHW element order.
    taps = []
    for kh in range(K):
        for kw in range(K):
            taps.append(xpad_ref[:, kh:kh + H, kw:kw + W].reshape(Cin, H * W))
    patches = jnp.concatenate(taps, axis=0)                   # (9*Cin, H*W) bf16

    acc = jnp.dot(w_ref[...], patches,
                  preferred_element_type=jnp.float32)         # (Cout, H*W) f32

    y_ref[0] = acc.astype(y_ref.dtype)                        # unmasked vst (H*W lanes)

    # Streamed BatchNorm moments from the f32 accumulator.
    s = jnp.sum(acc, axis=1, keepdims=True)                   # (Cout, 1)
    ss = jnp.sum(acc * acc, axis=1, keepdims=True)            # (Cout, 1)
    mom_ref[0] = jnp.concatenate([s, ss], axis=1)             # (Cout, 2)


def _bn_lrelu_kernel(y_ref, scale_ref, shift_ref, o_ref):
    """BN affine (precomputed per-channel scale/shift) + LeakyReLU(0.01).

    y_ref     : (1, Cout, H*W) bf16
    scale_ref : (Cout, 1) f32   (per-sublane-row broadcast over the lane dim)
    shift_ref : (Cout, 1) f32
    o_ref     : (1, Cout, H*W) f32
    """
    v = y_ref[0].astype(jnp.float32) * scale_ref[...] + shift_ref[...]
    o_ref[0] = jnp.where(v > 0, v, NEG_SLOPE * v).astype(o_ref.dtype)


def _vmem_limit_bytes():
    """Scoped-VMEM cap: 3/4 of physical capacity (None -> compiler default)."""
    try:
        cap = int(pltpu.get_tpu_info().vmem_capacity_bytes)
    except Exception:
        return None
    return min((cap * 3) // 4, 96 * 1024 * 1024)


def conv_layer_forward(x_nchw, w_hwio, gamma, beta):
    """ConvLayer forward.  x_nchw: (N, Cin, H, W) -> (N, Cout, H, W)."""
    N, Cin, H, W = x_nchw.shape
    Cout = w_hwio.shape[-1]
    HW = H * W

    # (kh, kw, cin)-major contraction rows; cast to bf16 once (MXU operand).
    w_flat = w_hwio.reshape(K * K * Cin, Cout).T.astype(jnp.bfloat16)  # (Cout, 9*Cin)

    cparams = pltpu.CompilerParams(
        dimension_semantics=("parallel",),
        vmem_limit_bytes=_vmem_limit_bytes(),
    )

    conv_kernel = functools.partial(
        _conv_moments_kernel, H=H, W=W, Cin=Cin, Cout=Cout)

    p1_bytes = (x_nchw.size * 4 + w_flat.size * 2
                + N * Cout * HW * 2 + N * Cout * 2 * 4)
    y, mom = pl.pallas_call(
        conv_kernel,
        grid=(N,),
        out_shape=(jax.ShapeDtypeStruct((N, Cout, HW), jnp.bfloat16),
                   jax.ShapeDtypeStruct((N, Cout, 2), jnp.float32)),
        in_specs=[pl.BlockSpec((1, Cin, H, W), lambda n: (n, 0, 0, 0)),
                  pl.BlockSpec((Cout, K * K * Cin), lambda n: (0, 0))],
        out_specs=(pl.BlockSpec((1, Cout, HW), lambda n: (n, 0, 0)),
                   pl.BlockSpec((1, Cout, 2), lambda n: (n, 0, 0))),
        scratch_shapes=[pltpu.VMEM((Cin, H + 2 * PAD, W + 2 * PAD), jnp.bfloat16)],
        compiler_params=cparams,
        cost_estimate=pl.CostEstimate(
            flops=2 * N * HW * K * K * Cin * Cout,
            transcendentals=0,
            bytes_accessed=p1_bytes),
    )(x_nchw, w_flat)

    # Tiny cross-image reduction of streamed moments -> batch statistics
    # (BatchNorm2d training mode: biased variance over N*H*W).
    count = N * HW
    mean = jnp.sum(mom[:, :, 0], axis=0) / count
    var = jnp.maximum(jnp.sum(mom[:, :, 1], axis=0) / count - mean * mean, 0.0)
    scale = gamma * lax.rsqrt(var + EPS)
    shift = beta - mean * scale

    p2_bytes = N * Cout * HW * 2 + 2 * Cout * 4 + N * Cout * HW * 4
    out = pl.pallas_call(
        _bn_lrelu_kernel,
        grid=(N,),
        out_shape=jax.ShapeDtypeStruct((N, Cout, HW), jnp.float32),
        in_specs=[pl.BlockSpec((1, Cout, HW), lambda n: (n, 0, 0)),
                  pl.BlockSpec((Cout, 1), lambda n: (0, 0)),
                  pl.BlockSpec((Cout, 1), lambda n: (0, 0))],
        out_specs=pl.BlockSpec((1, Cout, HW), lambda n: (n, 0, 0)),
        compiler_params=cparams,
        cost_estimate=pl.CostEstimate(
            flops=3 * N * Cout * HW, transcendentals=0, bytes_accessed=p2_bytes),
    )(y, scale.reshape(Cout, 1), shift.reshape(Cout, 1))

    # (N, Cout, H*W) -> (N, Cout, H, W): contiguous reshape, no data movement.
    return out.reshape(N, Cout, H, W)


def _reference_forward(x_nchw, w_hwio, gamma, beta):
    """Pure-JAX reference (lax conv + BN(train) + LeakyReLU) for validation."""
    x_nhwc = jnp.transpose(x_nchw, (0, 2, 3, 1))
    y = lax.conv_general_dilated(
        x_nhwc, w_hwio, window_strides=(1, 1),
        padding=[(PAD, PAD), (PAD, PAD)],
        dimension_numbers=("NHWC", "HWIO", "NHWC"))
    mean = jnp.mean(y, axis=(0, 1, 2))
    var = jnp.mean((y - mean) ** 2, axis=(0, 1, 2))
    yn = (y - mean) / jnp.sqrt(var + EPS) * gamma + beta
    out = jnp.where(yn > 0, yn, NEG_SLOPE * yn)
    return jnp.transpose(out, (0, 3, 1, 2))


if __name__ == "__main__":
    key = jax.random.PRNGKey(0)
    k_x, k_w = jax.random.split(key)

    # Small shapes consistent with the module: batch=2, in_ch=4, out_ch=8, 16x16.
    N, Cin, H, W = 2, 4, 16, 16
    Cout = 8

    x = jax.random.normal(k_x, (N, Cin, H, W), dtype=jnp.float32)   # NCHW input

    # Conv2d weights (kaiming-normal-like), HWIO layout; BN affine defaults.
    fan_in = Cin * K * K
    std = math.sqrt(2.0 / fan_in)
    w = std * jax.random.normal(k_w, (K, K, Cin, Cout), dtype=jnp.float32)
    gamma = jnp.ones((Cout,), jnp.float32)
    beta = jnp.zeros((Cout,), jnp.float32)

    out = jax.block_until_ready(conv_layer_forward(x, w, gamma, beta))
    ref = jax.block_until_ready(_reference_forward(x, w, gamma, beta))

    assert out.shape == (N, Cout, H, W), out.shape
    # bf16 MXU operands + bf16 y intermediate -> ~1% relative error budget.
    assert jnp.allclose(out, ref, rtol=2e-2, atol=2e-2), "mismatch vs reference"

    print("KERNEL_OK")
</pallas_src>

<mosaic_0001>
module attributes {stable_mosaic.version = 11 : i64} {
  func.func @_conv_moments_kernel(%arg0: i32, %arg1: memref<1x4x16x16xf32, #tpu.memory_space<vmem>>, %arg2: memref<8x36xbf16, #tpu.memory_space<vmem>>, %arg3: memref<1x8x256xbf16, #tpu.memory_space<vmem>>, %arg4: memref<1x8x2xf32, #tpu.memory_space<vmem>>, %arg5: memref<4x18x18xbf16, #tpu.memory_space<vmem>>) attributes {dimension_semantics = [#tpu.dimension_semantics<parallel>], iteration_bounds = array<i64: 2>, scalar_prefetch = 0 : i64, scratch_operands = 1 : i64, tpu.core_type = #tpu.core_type<tc>, window_params = [{transform_indices = @transform_0, window_bounds = array<i64: 1, 4, 16, 16>}, {pipeline_mode = #tpu.pipeline_mode<synchronous>, transform_indices = @transform_1, window_bounds = array<i64: 8, 36>}, {transform_indices = @transform_2, window_bounds = array<i64: 1, 8, 256>}, {transform_indices = @transform_3, window_bounds = array<i64: 1, 8, 2>}]} {
    %cst = arith.constant 0.000000e+00 : bf16
    %0 = vector.broadcast %cst : bf16 to vector<4x1x18xbf16>
    %cst_0 = arith.constant 0.000000e+00 : bf16
    %1 = vector.broadcast %cst_0 : bf16 to vector<4x18x1xbf16>
    %c0 = arith.constant 0 : index
    %c0_1 = arith.constant 0 : index
    %c0_2 = arith.constant 0 : index
    %2 = vector.load %arg5[%c0, %c0_1, %c0_2] : memref<4x18x18xbf16, #tpu.memory_space<vmem>>, vector<4x1x18xbf16>
    tpu.vector_store %arg5[%c0, %c0_1, %c0_2], %0 {strides = array<i32>} : memref<4x18x18xbf16, #tpu.memory_space<vmem>>, vector<4x1x18xbf16>,
    %c0_3 = arith.constant 0 : index
    %c17 = arith.constant 17 : index
    %c0_4 = arith.constant 0 : index
    %3 = vector.load %arg5[%c0_3, %c17, %c0_4] : memref<4x18x18xbf16, #tpu.memory_space<vmem>>, vector<4x1x18xbf16>
    tpu.vector_store %arg5[%c0_3, %c17, %c0_4], %0 {strides = array<i32>} : memref<4x18x18xbf16, #tpu.memory_space<vmem>>, vector<4x1x18xbf16>,
    %c0_5 = arith.constant 0 : index
    %c0_6 = arith.constant 0 : index
    %c0_7 = arith.constant 0 : index
    %4 = vector.load %arg5[%c0_5, %c0_6, %c0_7] : memref<4x18x18xbf16, #tpu.memory_space<vmem>>, vector<4x18x1xbf16>
    tpu.vector_store %arg5[%c0_5, %c0_6, %c0_7], %1 {strides = array<i32>} : memref<4x18x18xbf16, #tpu.memory_space<vmem>>, vector<4x18x1xbf16>,
    %c0_8 = arith.constant 0 : index
    %c0_9 = arith.constant 0 : index
    %c17_10 = arith.constant 17 : index
    %5 = vector.load %arg5[%c0_8, %c0_9, %c17_10] : memref<4x18x18xbf16, #tpu.memory_space<vmem>>, vector<4x18x1xbf16>
    tpu.vector_store %arg5[%c0_8, %c0_9, %c17_10], %1 {strides = array<i32>} : memref<4x18x18xbf16, #tpu.memory_space<vmem>>, vector<4x18x1xbf16>,
    %c0_11 = arith.constant 0 : index
    %c0_12 = arith.constant 0 : index
    %c0_13 = arith.constant 0 : index
    %c0_14 = arith.constant 0 : index
    %6 = vector.load %arg1[%c0_11, %c0_12, %c0_13, %c0_14] : memref<1x4x16x16xf32, #tpu.memory_space<vmem>>, vector<1x4x16x16xf32>
    %7 = vector.shape_cast %6 : vector<1x4x16x16xf32> to vector<4x16x16xf32>
    %8 = arith.truncf %7 : vector<4x16x16xf32> to vector<4x16x16xbf16>
    %c0_15 = arith.constant 0 : index
    %c1 = arith.constant 1 : index
    %c1_16 = arith.constant 1 : index
    %9 = vector.load %arg5[%c0_15, %c1, %c1_16] : memref<4x18x18xbf16, #tpu.memory_space<vmem>>, vector<4x16x16xbf16>
    tpu.vector_store %arg5[%c0_15, %c1, %c1_16], %8 {strides = array<i32>} : memref<4x18x18xbf16, #tpu.memory_space<vmem>>, vector<4x16x16xbf16>,
    %c0_17 = arith.constant 0 : index
    %c0_18 = arith.constant 0 : index
    %c0_19 = arith.constant 0 : index
    %10 = vector.load %arg5[%c0_17, %c0_18, %c0_19] : memref<4x18x18xbf16, #tpu.memory_space<vmem>>, vector<4x16x16xbf16>
    %11 = vector.shape_cast %10 : vector<4x16x16xbf16> to vector<4x256xbf16>
    %c0_20 = arith.constant 0 : index
    %c0_21 = arith.constant 0 : index
    %c1_22 = arith.constant 1 : index
    %12 = vector.load %arg5[%c0_20, %c0_21, %c1_22] : memref<4x18x18xbf16, #tpu.memory_space<vmem>>, vector<4x16x16xbf16>
    %13 = vector.shape_cast %12 : vector<4x16x16xbf16> to vector<4x256xbf16>
    %c0_23 = arith.constant 0 : index
    %c0_24 = arith.constant 0 : index
    %c2 = arith.constant 2 : index
    %14 = vector.load %arg5[%c0_23, %c0_24, %c2] : memref<4x18x18xbf16, #tpu.memory_space<vmem>>, vector<4x16x16xbf16>
    %15 = vector.shape_cast %14 : vector<4x16x16xbf16> to vector<4x256xbf16>
    %c0_25 = arith.constant 0 : index
    %c1_26 = arith.constant 1 : index
    %c0_27 = arith.constant 0 : index
    %16 = vector.load %arg5[%c0_25, %c1_26, %c0_27] : memref<4x18x18xbf16, #tpu.memory_space<vmem>>, vector<4x16x16xbf16>
    %17 = vector.shape_cast %16 : vector<4x16x16xbf16> to vector<4x256xbf16>
    %c0_28 = arith.constant 0 : index
    %c1_29 = arith.constant 1 : index
    %c1_30 = arith.constant 1 : index
    %18 = vector.load %arg5[%c0_28, %c1_29, %c1_30] : memref<4x18x18xbf16, #tpu.memory_space<vmem>>, vector<4x16x16xbf16>
    %19 = vector.shape_cast %18 : vector<4x16x16xbf16> to vector<4x256xbf16>
    %c0_31 = arith.constant 0 : index
    %c1_32 = arith.constant 1 : index
    %c2_33 = arith.constant 2 : index
    %20 = vector.load %arg5[%c0_31, %c1_32, %c2_33] : memref<4x18x18xbf16, #tpu.memory_space<vmem>>, vector<4x16x16xbf16>
    %21 = vector.shape_cast %20 : vector<4x16x16xbf16> to vector<4x256xbf16>
    %c0_34 = arith.constant 0 : index
    %c2_35 = arith.constant 2 : index
    %c0_36 = arith.constant 0 : index
    %22 = vector.load %arg5[%c0_34, %c2_35, %c0_36] : memref<4x18x18xbf16, #tpu.memory_space<vmem>>, vector<4x16x16xbf16>
    %23 = vector.shape_cast %22 : vector<4x16x16xbf16> to vector<4x256xbf16>
    %c0_37 = arith.constant 0 : index
    %c2_38 = arith.constant 2 : index
    %c1_39 = arith.constant 1 : index
    %24 = vector.load %arg5[%c0_37, %c2_38, %c1_39] : memref<4x18x18xbf16, #tpu.memory_space<vmem>>, vector<4x16x16xbf16>
    %25 = vector.shape_cast %24 : vector<4x16x16xbf16> to vector<4x256xbf16>
    %c0_40 = arith.constant 0 : index
    %c2_41 = arith.constant 2 : index
    %c2_42 = arith.constant 2 : index
    %26 = vector.load %arg5[%c0_40, %c2_41, %c2_42] : memref<4x18x18xbf16, #tpu.memory_space<vmem>>, vector<4x16x16xbf16>
    %27 = vector.shape_cast %26 : vector<4x16x16xbf16> to vector<4x256xbf16>
    %28 = tpu.concatenate %11, %13, %15, %17, %19, %21, %23, %25, %27 in 0 : vector<4x256xbf16>, vector<4x256xbf16>, vector<4x256xbf16>, vector<4x256xbf16>, vector<4x256xbf16>, vector<4x256xbf16>, vector<4x256xbf16>, vector<4x256xbf16>, vector<4x256xbf16> -> vector<36x256xbf16>
    %c0_43 = arith.constant 0 : index
    %c0_44 = arith.constant 0 : index
    %29 = vector.load %arg2[%c0_43, %c0_44] : memref<8x36xbf16, #tpu.memory_space<vmem>>, vector<8x36xbf16>
    %cst_45 = arith.constant dense<0.000000e+00> : vector<8x256xf32>
    %30 = tpu.matmul %29, %28, %cst_45 {dimension_numbers = #tpu.dot_dimension_numbers<[1], [0], [0], [1], [0, 0, 1, 1], [], []>} : vector<8x36xbf16>, vector<36x256xbf16>, vector<8x256xf32> -> vector<8x256xf32>
    %31 = arith.truncf %30 : vector<8x256xf32> to vector<8x256xbf16>
    %c0_46 = arith.constant 0 : index
    %c0_47 = arith.constant 0 : index
    %c0_48 = arith.constant 0 : index
    %32 = vector.load %arg3[%c0_46, %c0_47, %c0_48] : memref<1x8x256xbf16, #tpu.memory_space<vmem>>, vector<1x8x256xbf16>
    %33 = vector.shape_cast %32 : vector<1x8x256xbf16> to vector<8x256xbf16>
    %34 = vector.shape_cast %31 : vector<8x256xbf16> to vector<1x8x256xbf16>
    tpu.vector_store %arg3[%c0_46, %c0_47, %c0_48], %34 {strides = array<i32>} : memref<1x8x256xbf16, #tpu.memory_space<vmem>>, vector<1x8x256xbf16>,
    %cst_49 = arith.constant dense<0.000000e+00> : vector<8xf32>
    %35 = vector.multi_reduction <add>, %30, %cst_49 [1] : vector<8x256xf32> to vector<8xf32>
    %36 = vector.shape_cast %35 : vector<8xf32> to vector<8x1xf32>
    %37 = arith.mulf %30, %30 : vector<8x256xf32>
    %cst_50 = arith.constant dense<0.000000e+00> : vector<8xf32>
    %38 = vector.multi_reduction <add>, %37, %cst_50 [1] : vector<8x256xf32> to vector<8xf32>
    %39 = vector.shape_cast %38 : vector<8xf32> to vector<8x1xf32>
    %40 = tpu.concatenate %36, %39 in 1 : vector<8x1xf32>, vector<8x1xf32> -> vector<8x2xf32>
    %c0_51 = arith.constant 0 : index
    %c0_52 = arith.constant 0 : index
    %c0_53 = arith.constant 0 : index
    %41 = vector.load %arg4[%c0_51, %c0_52, %c0_53] : memref<1x8x2xf32, #tpu.memory_space<vmem>>, vector<1x8x2xf32>
    %42 = vector.shape_cast %41 : vector<1x8x2xf32> to vector<8x2xf32>
    %43 = vector.shape_cast %40 : vector<8x2xf32> to vector<1x8x2xf32>
    tpu.vector_store %arg4[%c0_51, %c0_52, %c0_53], %43 {strides = array<i32>} : memref<1x8x2xf32, #tpu.memory_space<vmem>>, vector<1x8x2xf32>,
    return
  }
  func.func @transform_0(%arg0: i32) -> (i32, i32, i32, i32) {
    %c0_i32 = arith.constant 0 : i32
    %c0_i32_0 = arith.constant 0 : i32
    %c0_i32_1 = arith.constant 0 : i32
    %c0_i32_2 = arith.constant 0 : i32
    return %arg0, %c0_i32, %c0_i32_0, %c0_i32_1 : i32, i32, i32, i32
  }
  func.func @transform_1(%arg0: i32) -> (i32, i32) {
    %c0_i32 = arith.constant 0 : i32
    %c0_i32_0 = arith.constant 0 : i32
    %c0_i32_1 = arith.constant 0 : i32
    return %c0_i32, %c0_i32_0 : i32, i32
  }
  func.func @transform_2(%arg0: i32) -> (i32, i32, i32) {
    %c0_i32 = arith.constant 0 : i32
    %c0_i32_0 = arith.constant 0 : i32
    %c0_i32_1 = arith.constant 0 : i32
    return %arg0, %c0_i32, %c0_i32_0 : i32, i32, i32
  }
  func.func @transform_3(%arg0: i32) -> (i32, i32, i32) {
    %c0_i32 = arith.constant 0 : i32
    %c0_i32_0 = arith.constant 0 : i32
    %c0_i32_1 = arith.constant 0 : i32
    return %arg0, %c0_i32, %c0_i32_0 : i32, i32, i32
  }
}

</mosaic_0001>

<bundles_post_ra>
// kernel: tpu_custom_call.1
= control target key start
LH: loop header
LB: loop body
LE: loop exit
PB: predicated region body
PF: predicated region fallthrough
CT: control target
= control target key end

     0   :  { %9 = vsyncpa [#allocation4], 0  ;;  %s5657_s0 = inlined_call_operand.hbm [shape: f32[2,4,16,16], index: 0, kind: input, shape index: {}]   ;;  %s5658_s1 = inlined_call_operand.hbm [shape: bf16[8,36], index: 1, kind: input, shape index: {}]   ;;  %s5659_s2 = inlined_call_operand.hbm [shape: bf16[2,8,256], index: 2, kind: output, shape index: {0}]   ;;  %s5660_s3 = inlined_call_operand.vmem [shape: f32[2,8,2], index: 3, kind: output, shape index: {1}]  }
   0x1   :  { %11 = vsyncpa [#allocation4 + $0x1], 0 }
   0x2   :  { %12 = vsyncpa [#allocation7], 0 }
   0x3   :  { %13 = vsyncpa [#allocation5], 0 }
   0x4   :  { %15 = vsyncpa [#allocation5 + $0x1], 0  ;;  %s3764_s12 = smov 0   ;;  %s3766_s13 = smov 0  }
   0x5   :  { %s3768_s14 = smov 0   ;;  %s3770_s15 = smov 0  }
   0x6 LB: > { %s3785_s16 = sadd.s32 4294967295, %s3724_s15   ;;  %s3283_s17 = sadd.s32 4294967294, %s3724_s15   ;;  %s3724_s15 = sphi %s3770_s15, %s5798_s15   ;;  %s3720_s14 = sphi %s3768_s14, %s5797_s14   ;;  %s3716_s13 = sphi %s3766_s13, %s5796_s13   ;;  %s3712_s12 = sphi %s3764_s12, %s5795_s12  }
   0x7   : > { %s3789_s18 = sadd.s32 1, %s3724_s15   ;;  %s28_s19 = sadd.s32 1, %s3720_s14 }
   0x8   : > { %s25_s20 = ssub.s32 %s3724_s15, %s3789_s18  ;;  %p35_p0 = scmp.ne.s32.totalorder %s3720_s14, %s3716_s13 }
   0x9   : > { %p26_p1 = scmp.eq.s32.totalorder %s25_s20, 0  ;;  %p36_p2 = scmp.eq.s32.totalorder %s3724_s15, 0 }
   0xa   : > { %p41_p3 = scmp.ne.s32.totalorder %s3716_s13, %s3712_s12  ;;  %p5661_p4 = scmp.eq.s32.totalorder %s3785_s16, 0 }
   0xb   : > { %s3801_s21 = scalar_select %p26_p1, %s3720_s14, %s28_s19  }
   0xc   : > { %p3803_p5 = por %p36_p2, %p35_p0  ;;  %p3809_p6 = por %p5661_p4, %p41_p3 }
   0xd   : > { %p86_p7 = scmp.eq.s32.totalorder %s3785_s16, 1  ;;  %p92_p8 = scmp.eq.s32.totalorder %s3283_s17, 1 }
   0xe   : > { %s5684_s23 = scalar_select %p3809_p6, 1, 0 }
   0xf   : > { %p3284_p9 = scmp.ge.s32.totalorder %s3724_s15, 1  ;;  %p125_p10 = scmp.lt.s32.totalorder %s3724_s15, 3 }
  0x10   : > { %p3816_p11 = por %p86_p7, %p35_p0  ;;  %p3820_p12 = por %p92_p8, %p41_p3 }
  0x11   : > { %p3824_p13 = pnand %p3284_p9, %p125_p10  ;;  %s3726_s27 = smov [#allocation6]  }
  0x12   : > { %s5685_s24 = scalar_select %p3816_p11, 1, 0 }
  0x13   : > { %s5686_s25 = scalar_select %p3820_p12, 1, 0 }
  0x14   : > { %s5687_s26 = scalar_select %p3824_p13, 1, 0 }
  0x15   : > { %p3532_p2 = pneg %p3824_p13  ;;  %s138_s28 = sshll.u32 %s3726_s27, 4  ;;  %s139_s28 = int_to_ptr.vmem [resolvable:$true] %s138_s28 }
  0x16   : > { %p3545_p4 = scmp.lt.s32.totalorder %s3724_s15, 2  ;;  %p5688_p0 = scmp.eq.s32.totalorder %s3785_s16, 0 }
  0x17   : > { %s149_s30 = sand.u32 1, %s3720_s14   ;;  %s3596_s8 = scalar_lea.hbm %s5658_s1, 64 }
  0x18   : > { %p3834_p7 = pnand %p3532_p2, %p5688_p0  ;;  %p3841_p3 = pnand %p3545_p4, %p3803_p5 }
  0x19   : > { %s3287_s5 = sshll.u32 %s149_s30, 6  ;;  %p3597_p8 = scmp.ne.s32.totalorder %s5658_s1, %s3596_s8 }
  0x1a   : > { %s5690_s4 = scalar_select %p3841_p3, 1, 0 }
  0x1b   : > { %p3598_p9 = pneg %p3834_p7  ;;  %p3603_p4 = scmp.lt.u32.totalorder %s3596_s8, %s5658_s1 }
  0x1d   : > { %p3599_p10 = pnand %p3598_p9, %p3597_p8 }
  0x1f   : > { %p3600_p2 = pneg %p3599_p10 }
  0x21   : > { %p3605_p5 = pnand %p3603_p4, %p3600_p2 }
  0x23   : > { %3608 = shalt.err (!%p3605_p5)
}
  0x24   : > { %s3609_s19 = scalar_lea.vmem %s139_s28, 64  ;;  %p3617_p11 = scmp.lt.s32.totalorder %s139_s28, %s139_s28 }
  0x25   : > { %p3610_p0 = scmp.ne.s32.totalorder %s139_s28, %s3609_s19  ;;  %p3618_p6 = scmp.lt.s32.totalorder %s3609_s19, %s3609_s19 }
  0x27   : > { %p3612_p1 = pnand %p3610_p0, %p3598_p9  ;;  %p3619_p13 = por %p3618_p6, %p3617_p11 }
  0x29   : > { %p3613_p12 = pneg %p3612_p1 }
  0x2b   : > { %p3620_p3 = pnand %p3619_p13, %p3613_p12 }
  0x2d   : > { %3623 = shalt.err (!%p3620_p3)
}
  0x2e   : > { %3535 = dma.hbm_to_vmem [thread:$0]  (!%p3834_p7), %s5658_s1, 64, %s139_s28, [#allocation7]  }
  0x2f   : > { %s3441_s27 = sshll.u32 %s3724_s15, 10  ;;  %s153_s6 = scalar_lea.vmem [#allocation3], %s3287_s5 }
  0x30   : > { %s160_s7 = sshll.u32 %s153_s6, 4  ;;  %s3865_s10 = scalar_lea.hbm %s5657_s0, %s3441_s27  ;;  %s3867_s7 = int_to_ptr.vmem [resolvable:$true] %s160_s7 }
  0x31   : > { %s3869_s29 = scalar_lea.sflag [#allocation4], %s149_s30  ;;  %s3624_s11 = scalar_lea.hbm %s3865_s10, 1024 }
  0x32   : > { %p3625_p6 = scmp.ne.s32.totalorder %s3865_s10, %s3624_s11  ;;  %p5691_p11 = scmp.ne.s32.totalorder %s5690_s4, 0 }
  0x33   : > { %s3629_s17 = scalar_lea.hbm %s5657_s0, 2048  ;;  %p3630_p7 = scmp.lt.u32.totalorder %s3865_s10, %s5657_s0 }
  0x34   : > { %p3626_p12 = pneg %p5691_p11  ;;  %p3631_p3 = scmp.lt.u32.totalorder %s3629_s17, %s3624_s11 }
  0x35   : > { %p3633_p9 = scmp.lt.u32.totalorder %s3624_s11, %s3865_s10 }
  0x36   : > { %p3627_p13 = pnand %p3626_p12, %p3625_p6  ;;  %p3632_p8 = por %p3631_p3, %p3630_p7 }
  0x38   : > { %p3628_p1 = pneg %p3627_p13  ;;  %p3634_p10 = por %p3633_p9, %p3632_p8 }
  0x3a   : > { %p3635_p2 = pnand %p3634_p10, %p3628_p1 }
  0x3c   : > { %3638 = shalt.err (!%p3635_p2)
}
  0x3d   : > { %s3639_s30 = scalar_lea.vmem %s3867_s7, 1024  ;;  %s3727_s22 = smov [#allocation3]  }
  0x3e   : > { %p3640_p4 = scmp.ne.s32.totalorder %s3867_s7, %s3639_s30  ;;  %s3644_s27 = sshll.u32 %s3727_s22, 4  ;;  %s3645_s27 = int_to_ptr.vmem [resolvable:$false] %s3644_s27 }
  0x3f   : > { %s3646_s6 = scalar_lea.vmem %s3645_s27, 2048  ;;  %p3647_p6 = scmp.lt.s32.totalorder %s3867_s7, %s3645_s27 }
  0x40   : > { %p3642_p5 = pnand %p3640_p4, %p3626_p12  ;;  %p3648_p13 = scmp.lt.s32.totalorder %s3646_s6, %s3639_s30 }
  0x42   : > { %p3643_p0 = pneg %p3642_p5  ;;  %p3649_p7 = por %p3648_p13, %p3647_p6 }
  0x44   : > { %p3650_p3 = pnand %p3649_p7, %p3643_p0 }
  0x46   : > { %3653 = shalt.err (!%p3650_p3)
}
  0x47   : > { %s3728_s8 = smov 128   ;;  %s3729_s9 = smov 8  }
  0x48   : > { %3539 = dma.hbm_to_vmem [thread:$0]  (!%p5691_p11), %s3865_s10, 1024, %s3867_s7, %s3869_s29, %s3728_s8, %s3728_s8, %s3729_s9  }
  0x49   : > { %p5692_p12 = scmp.ne.s32.totalorder %s5687_s26, 0 }
  0x4b   : > { %172 = sbr.rel (%p5692_p12) target bundleno = 1064 (0x428), region = 28 }
  0x52   : > { %s3900_s11 = sand.u32 1, %s3716_s13   ;;  %p5693_p1 = scmp.ne.s32.totalorder %s5684_s23, 0 }
  0x53   : > { %s3291_s28 = sshll.u32 %s3900_s11, 6  ;;  %s175_s5 = scalar_lea.sflag [#allocation4], %s3900_s11 }
  0x54   : > { %s3904_s17 = scalar_lea.vmem [#allocation3], %s3291_s28 }
  0x55   : > { %3699 = dma.done.wait (%p5693_p1), %s175_s5, 1024  }
  0x56   : > { %3701 = vsyncadd (%p5693_p1), %s175_s5, 4294966272  ;;  %p5694_p11 = scmp.eq.s32.totalorder %s3785_s16, 0 }
  0x58   : > { %3703 = dma.done.wait (%p5694_p11), [#allocation7], 64   ;;  %p5695_p8 = pmov %p5694_p11 }
  0x59   : > { %vm243_vm0 = vcmask 3072   ;;  %vm257_vm1 = vcmask 142472   ;;  %v3730_v0 = vmov 0   ;;  %v273_v1 = vld [vmem:[%s3904_s17 + $0x10] sm:$0xff]  ;;  %v271_v2 = vld [vmem:[%s3904_s17] sm:$0xff]  ;;  %v274_v3 = vld [vmem:[%s3904_s17 + $0x18] sm:$0xff] }
  0x5a   : > { %3705 = vsyncadd (%p5695_p8), [#allocation7], 4294967232  ;;  %245 = vst.msk [vmem:[#allocation2 + $0x4] sm:$0xf] %vm243_vm0, %v3730_v0  ;;  %3127 = vmatprep.mubr.bf16.mxu0 %v3730_v0  ;;  %vm215_vm2 = vsmask.f32 256  ;;  %v3444_v4 = vpack.c.bf16 %v273_v1, %v273_v1  ;;  %v3442_v5 = vpack.c.bf16 %v271_v2, %v271_v2  ;;  %v3445_v6 = vpack.c.bf16 %v274_v3, %v274_v3 }
  0x5b   : > { %249 = vst.msk [vmem:[#allocation2 + $0x10] sm:$0xf] %vm243_vm0, %v3730_v0  ;;  %252 = vst.msk [vmem:[#allocation2 + $0x1c] sm:$0xf] %vm243_vm0, %v3730_v0  ;;  %v275_v7 = vld [vmem:[%s3904_s17 + $0x20] sm:$0xff]  ;;  %v277_v8 = vld [vmem:[%s3904_s17 + $0x30] sm:$0xff] }
  0x5c   : > { %255 = vst.msk [vmem:[#allocation2 + $0x28] sm:$0xf] %vm243_vm0, %v3730_v0  ;;  %v276_v9 = vld [vmem:[%s3904_s17 + $0x28] sm:$0xff]  ;;  %vm214_vm3 = vcmask 139264   ;;  %v3446_v10 = vpack.c.bf16 %v275_v7, %v275_v7  ;;  %vm303_vm4 = vsmask.f32 4368  ;;  %v3448_v11 = vpack.c.bf16 %v277_v8, %v277_v8 }
  0x5d   : > { %259 = vst.msk [vmem:[#allocation2 + $0x4] sm:$0xf] %vm257_vm1, %v3730_v0  ;;  %263 = vst.msk [vmem:[#allocation2 + $0x10] sm:$0xf] %vm257_vm1, %v3730_v0  ;;  %v3447_v12 = vpack.c.bf16 %v276_v9, %v276_v9  ;;  %v323_v13 = vshrl.u32 %v3444_v4, 16  ;;  %v326_v14 = vshll.u32 %v3444_v4, 16 }
  0x5e   : > { %266 = vst.msk [vmem:[#allocation2 + $0x1c] sm:$0xf] %vm257_vm1, %v3730_v0  ;;  %269 = vst.msk [vmem:[#allocation2 + $0x28] sm:$0xf] %vm257_vm1, %v3730_v0  ;;  %v306_v15 = vshrl.u32 %v3442_v5, 16  ;;  %v309_v16 = vshll.u32 %v3442_v5, 16 }
  0x5f   : > { %v331_v17 = vshrl.u32 %v3445_v6, 16  ;;  %v340_v18 = vshrl.u32 %v3446_v10, 16  ;;  %v334_v19 = vshll.u32 %v3445_v6, 16  ;;  %vm229_vm5 = vsmask.f32 7938  ;;  %v272_v27 = vld [vmem:[%s3904_s17 + $0x8] sm:$0xff]  ;;  %vm3946_vm8 = vmand %vm214_vm3, %vm215_vm2 }
  0x60   : > { %v325_v20 = vrot.slane %v323_v13, 7  ;;  %v3937_v21 = vrot.slane %v306_v15, 7  ;;  %v343_v22 = vshll.u32 %v3446_v10, 16  ;;  %v357_v23 = vshrl.u32 %v3448_v11, 16  ;;  %v278_v28 = vld [vmem:[%s3904_s17 + $0x38] sm:$0xff]  ;;  %vm3952_vm9 = vmor %vm215_vm2, %vm303_vm4  ;;  %s3731_s23 = smov 1  }
  0x61   : > { %vm246_vm6 = vcmask 0   ;;  %v333_v24 = vrot.slane %v331_v17, 7  ;;  %v3939_v25 = vrot.slane %v340_v18, 7  ;;  %v348_v26 = vshrl.u32 %v3447_v12, 16  ;;  %v217_v34 = vld [vmem:[#allocation2] sm:$0x1]  ;;  %vm3971_vm10 = vmand %vm214_vm3, %vm229_vm5 }
  0x62   : > { %vm260_vm7 = vcmask 139400   ;;  %v328_v29 = vor.u32 %v326_v14, %v325_v20  ;;  %v329_v30 = vrot.slane %v325_v20, 4  ;;  %v311_v31 = vor.u32 %v309_v16, %v3937_v21  ;;  %v220_v40 = vld [vmem:[#allocation2 + $0xc] sm:$0x1]  ;;  %v223_v45 = vld [vmem:[#allocation2 + $0x18] sm:$0x1] }
  0x63   : > { %v360_v32 = vshll.u32 %v3448_v11, 16  ;;  %v338_v35 = vrot.slane %v333_v24, 4  ;;  %v336_v37 = vor.u32 %v334_v19, %v333_v24  ;;  %v3956_v38 = vrot.slane %v357_v23, 7  ;;  %v226_v46 = vld [vmem:[#allocation2 + $0x24] sm:$0x1]  ;;  %s3732_s26 = smov 127  }
  0x64   : > { %v351_v39 = vshll.u32 %v3447_v12, 16  ;;  %379 = vrot.lane.b32.xlu1 %v328_v29, %s3731_s23  ;;  %373 = vrot.lane.b32.xlu0 %v311_v31, %s3731_s23  ;;  %v345_v41 = vor.u32 %v343_v22, %v3939_v25  ;;  %v3961_v42 = vrot.slane %v348_v26, 7  ;;  %v3443_v43 = vpack.c.bf16 %v272_v27, %v272_v27  ;;  %v231_v49 = vld [vmem:[#allocation2 + $0x8] sm:$0x1]  ;;  %v234_v50 = vld [vmem:[#allocation2 + $0x14] sm:$0x1] }
  0x65   : > { %v3449_v44 = vpack.c.bf16 %v278_v28, %v278_v28  ;;  %v346_v47 = vrot.slane %v3939_v25, 4  ;;  %v218_v48 = vsel %vm3946_vm8, 0, %v217_v34  ;;  %v337_v51 = vsel %vm3952_vm9, %v329_v30, %v336_v37  ;;  %v237_v56 = vld [vmem:[#allocation2 + $0x20] sm:$0x1]  ;;  %v240_v57 = vld [vmem:[#allocation2 + $0x2c] sm:$0x1] }
  0x66   : > { %v362_v52 = vor.u32 %v360_v32, %v3956_v38  ;;  %v314_v53 = vshrl.u32 %v3443_v43, 16  ;;  %219 = vst [vmem:[#allocation2] sm:$0x1] %v218_v48  ;;  %v353_v58 = vor.u32 %v351_v39, %v3961_v42  ;;  %v221_v60 = vsel %vm3946_vm8, 0, %v220_v40  ;;  %s3734_s4 = smov 126   ;;  %s3736_s7 = smov 32  }
  0x67   : > { %v365_v54 = vshrl.u32 %v3449_v44, 16  ;;  %v368_v59 = vshll.u32 %v3449_v44, 16  ;;  %v224_v61 = vsel %vm3946_vm8, 0, %v223_v45  ;;  %244 = vst.msk [vmem:[#allocation2] sm:$0xf] %vm243_vm0, %v3730_v0  ;;  %v317_v1 = vshll.u32 %v3443_v43, 16 }
  0x68   : > { %383 = vrot.lane.b32.xlu1 %v338_v35, %s3731_s23  ;;  %385 = vrot.lane.b32.xlu0 %v345_v41, %s3731_s23  ;;  %v316_v62 = vrot.slane %v314_v53, 7  ;;  %222 = vst [vmem:[#allocation2 + $0xc] sm:$0x1] %v221_v60  ;;  %225 = vst [vmem:[#allocation2 + $0x18] sm:$0x1] %v224_v61  ;;  %v227_v2 = vsel %vm3946_vm8, 0, %v226_v46  ;;  %v354_v9 = vsel %vm3952_vm9, %v346_v47, %v353_v58 }
  0x69   : > { %v367_v63 = vrot.slane %v365_v54, 7  ;;  %258 = vst.msk [vmem:[#allocation2] sm:$0xf] %vm257_vm1, %v3730_v0  ;;  %228 = vst [vmem:[#allocation2 + $0x24] sm:$0x1] %v227_v2  ;;  %v232_v3 = vsel %vm3971_vm10, 0, %v231_v49 }
  0x6a   : > { %v235_v4 = vsel %vm3971_vm10, 0, %v234_v50  ;;  %v238_v5 = vsel %vm3971_vm10, 0, %v237_v56  ;;  %v241_v6 = vsel %vm3971_vm10, 0, %v240_v57  ;;  %248 = vst.msk [vmem:[#allocation2 + $0xc] sm:$0xf] %vm243_vm0, %v3730_v0  ;;  %v312_v7 = vrot.slane %v3937_v21, 4 }
  0x6b   : > { %251 = vst.msk [vmem:[#allocation2 + $0x18] sm:$0xf] %vm243_vm0, %v3730_v0  ;;  %233 = vst [vmem:[#allocation2 + $0x8] sm:$0x1] %v232_v3  ;;  %v321_v8 = vrot.slane %v316_v62, 4  ;;  %v363_v10 = vrot.slane %v3956_v38, 4  ;;  %v370_v11 = vor.u32 %v368_v59, %v367_v63  ;;  %v319_v12 = vor.u32 %v317_v1, %v316_v62 }
  0x6c   : > { %236 = vst [vmem:[#allocation2 + $0x14] sm:$0x1] %v235_v4  ;;  %239 = vst [vmem:[#allocation2 + $0x20] sm:$0x1] %v238_v5  ;;  %381 = vrot.lane.b32.xlu1 %v337_v51, %s3731_s23  ;;  %391 = vrot.lane.b32.xlu0 %v362_v52, %s3731_s23  ;;  %v355_v15 = vrot.slane %v3961_v42, 4  ;;  %vm409_vm11 = vcmask 134152  }
  0x6d   : > { %242 = vst [vmem:[#allocation2 + $0x2c] sm:$0x1] %v241_v6  ;;  %262 = vst.msk [vmem:[#allocation2 + $0xc] sm:$0xf] %vm257_vm1, %v3730_v0  ;;  %v371_v13 = vsel %vm3952_vm9, %v363_v10, %v370_v11  ;;  %v320_v14 = vsel %vm3952_vm9, %v312_v7, %v319_v12  ;;  %vm416_vm13 = vcmask 131080   ;;  %vm2188_vm15 = vcmask 1042432  }
  0x6e   : > { %254 = vst.msk [vmem:[#allocation2 + $0x24] sm:$0xf] %vm243_vm0, %v3730_v0  ;;  %vm4043_vm12 = vmand %vm409_vm11, %vm229_vm5  ;;  %vm2189_vm0 = vcmask 1046532   ;;  %vm1282_vm3 = vsmask.f32 7440  ;;  %s3737_s10 = smov 48  }
  0x6f   : > { %265 = vst.msk [vmem:[#allocation2 + $0x18] sm:$0xf] %vm257_vm1, %v3730_v0  ;;  %268 = vst.msk [vmem:[#allocation2 + $0x24] sm:$0xf] %vm257_vm1, %v3730_v0  ;;  %s3738_s29 = smov 64   ;;  %s3739_s19 = smov 80  }
  0x70   : > { %247 = vst.msk [vmem:[#allocation2 + $0x8] sm:$0x1] %vm246_vm6, %v3730_v0  ;;  %250 = vst.msk [vmem:[#allocation2 + $0x14] sm:$0x1] %vm246_vm6, %v3730_v0  ;;  %387 = vrot.lane.b32.xlu1 %v354_v9, %s3731_s23  ;;  %377 = vrot.lane.b32.xlu0 %v321_v8, %s3731_s23  ;;  %v411_v18 = vld [vmem:[#allocation2] sm:$0xf] }
  0x71   : > { %253 = vst.msk [vmem:[#allocation2 + $0x20] sm:$0x1] %vm246_vm6, %v3730_v0  ;;  %256 = vst.msk [vmem:[#allocation2 + $0x2c] sm:$0x1] %vm246_vm6, %v3730_v0  ;;  %s3740_s20 = smov 16   ;;  %s3741_s30 = smov 96  }
  0x72   : > { %264 = vst.msk [vmem:[#allocation2 + $0x14] sm:$0x1] %vm260_vm7, %v3730_v0  ;;  %261 = vst.msk [vmem:[#allocation2 + $0x8] sm:$0x1] %vm260_vm7, %v3730_v0  ;;  %s3742_s22 = smov 112   ;;  %vm680_vm5 = vcmask 130048  }
  0x73   : > { %267 = vst.msk [vmem:[#allocation2 + $0x20] sm:$0x1] %vm260_vm7, %v3730_v0  ;;  %270 = vst.msk [vmem:[#allocation2 + $0x2c] sm:$0x1] %vm260_vm7, %v3730_v0  ;;  %v372_v0 = vrot.slane %v367_v63, 4  ;;  %vm684_vm6 = vcmask 261120  }
  0x74   : > { %393 = vrot.lane.b32.xlu1 %v371_v13, %s3731_s23  ;;  %375 = vrot.lane.b32.xlu0 %v320_v14, %s3731_s23  ;;  %v421_v17 = vld [vmem:[#allocation2 + $0xc] sm:$0xf]  ;;  %vm4052_vm14 = vmand %vm416_vm13, %vm215_vm2  ;;  %vm1281_vm2 = vsmask.f32 3328  ;;  %vm687_vm7 = vcmask 392192   ;;  %vm690_vm8 = vcmask 523264  }
  0x75   : > { %vm4090_vm1 = vmor %vm2188_vm15, %vm2189_vm0  ;;  %vm693_vm9 = vcmask 654336   ;;  %vm696_vm10 = vcmask 785408   ;;  %vm3060_vm13 = vcmask 1043456   ;;  %vm3087_vm15 = vcmask 293888   ;;  %s3293_s27 = sshll.u32 %s3900_s11, 3  ;;  %s3523_s8 = sshll.u32 %s3785_s16, 7 }
  0x76   : > { %v428_v25 = vld [vmem:[#allocation2 + $0x18] sm:$0xf]  ;;  %v435_v30 = vld [vmem:[#allocation2 + $0x24] sm:$0xf]  ;;  %vm4332_vm4 = vmor %vm1281_vm2, %vm1282_vm3  ;;  %s202_s6 = scalar_lea.vmem [#allocation8], %s3293_s27  ;;  %s5614_s5 = scalar_lea.hbm %s5659_s2, %s3523_s8 }
  0x77   : > { %s3176_s17 = sshll.u32 %s202_s6, 4  ;;  %p5792_p10 = scmp.ne.s32.totalorder %s5685_s24, 0  ;;  %s3177_s17 = int_to_ptr.vmem [resolvable:$true] %s3176_s17 }
  0x78   : > { %395 = vrot.lane.b32.xlu1 %v372_v0, %s3731_s23  ;;  %389 = vrot.lane.b32.xlu0 %v355_v15, %s3731_s23  ;;  %s3158_s23 = scalar_lea.sflag [#allocation5], %s3900_s11 }
  0x79   : > { %v425_v24 = vld [vmem:[#allocation2 + $0x14] sm:$0x1]  ;;  %v418_v36 = vld [vmem:[#allocation2 + $0x8] sm:$0x1] }
  0x7a   : > { %v439_v44 = vld [vmem:[#allocation2 + $0x2c] sm:$0x1]  ;;  %v432_v45 = vld [vmem:[#allocation2 + $0x20] sm:$0x1] }
  0xd6   : > { %v380_v19 = vpop.permute.xlu1 %379  ;;  %v374_v20 = vpop.permute.xlu0 %373 }
  0xd7   : > { %v422_v21 = vsel %vm4043_vm12, %v380_v19, %v421_v17  ;;  %v412_v22 = vsel %vm4043_vm12, %v374_v20, %v411_v18 }
  0xd8   : > { %423 = vst [vmem:[#allocation2 + $0xc] sm:$0xf] %v422_v21  ;;  %413 = vst [vmem:[#allocation2] sm:$0xf] %v412_v22 }
  0xda   : > { %v384_v26 = vpop.permute.xlu1 %383  ;;  %v386_v27 = vpop.permute.xlu0 %385 }
  0xdb   : > { %v426_v28 = vsel %vm4052_vm14, %v384_v26, %v425_v24  ;;  %v429_v29 = vsel %vm4043_vm12, %v386_v27, %v428_v25  ;;  %v3733_v24 = vmov 1983009808   ;;  %v478_v26 = vlaneseq }
  0xdc   : > { %427 = vst [vmem:[#allocation2 + $0x14] sm:$0x1] %v426_v28  ;;  %430 = vst [vmem:[#allocation2 + $0x18] sm:$0xf] %v429_v29  ;;  %v476_v25 = vunpack.c.l.s4 %v3733_v24 }
  0xdd   : > { %v4159_v28 = vshrl.u32 %v478_v26, 7 }
  0xde   : > { %v382_v31 = vpop.permute.xlu1 %381  ;;  %v392_v32 = vpop.permute.xlu0 %391  ;;  %v477_v27 = vunpack.c.0.s8 %v476_v25 }
  0xdf   : > { %424 = vst.msk [vmem:[#allocation2 + $0x10] sm:$0xf] %vm409_vm11, %v382_v31  ;;  %v436_v33 = vsel %vm4043_vm12, %v392_v32, %v435_v30  ;;  %v4063_v34 = vld [vmem:[#allocation2 + $0xc] sm:$0xf]  ;;  %v4065_v35 = vld [vmem:[#allocation2] sm:$0xf] }
  0xe0   : > { %437 = vst [vmem:[#allocation2 + $0x24] sm:$0xf] %v436_v33  ;;  %v452_v37 = vpack.i.b16 %v4063_v34, %v4065_v35  ;;  %v2177_v49 = vld [vmem:[#allocation2 + $0xc] sm:$0xe]  ;;  %v2176_v50 = vld [vmem:[#allocation2] sm:$0xe]  ;;  %v4170_v31 = vsub.s32 %v477_v27, %v4159_v28 }
  0xe1   : > { %v3388_v59 = vrot.slane %v2177_v49, 9  ;;  %v3387_v2 = vrot.slane %v2176_v50, 9  ;;  %vm3055_vm12 = vcmask 1041408  }
  0xe2   : > { %v388_v38 = vpop.permute.xlu1 %387  ;;  %v378_v39 = vpop.permute.xlu0 %377 }
  0xe3   : > { %431 = vst.msk [vmem:[#allocation2 + $0x1c] sm:$0xf] %vm409_vm11, %v388_v38  ;;  %v419_v40 = vsel %vm4052_vm14, %v378_v39, %v418_v36  ;;  %v2178_v55 = vld [vmem:[#allocation2 + $0x18] sm:$0xe]  ;;  %v4094_v60 = vld [vmem:[#allocation2 + $0x14] sm:$0x1] }
  0xe4   : > { %420 = vst [vmem:[#allocation2 + $0x8] sm:$0x1] %v419_v40  ;;  %v4087_v56 = vld [vmem:[#allocation2 + $0x18] sm:$0xf]  ;;  %v3389_v3 = vrot.slane %v2178_v55, 9  ;;  %v2203_v10 = vrot.slane %v4094_v60, 5 }
  0xe6   : > { %v394_v41 = vpop.permute.xlu1 %393  ;;  %v376_v42 = vpop.permute.xlu0 %375  ;;  %v4072_v43 = vld [vmem:[#allocation2 + $0x10] sm:$0xf] }
  0xe7   : > { %438 = vst.msk [vmem:[#allocation2 + $0x28] sm:$0xf] %vm409_vm11, %v394_v41  ;;  %415 = vst.msk [vmem:[#allocation2 + $0x4] sm:$0xf] %vm409_vm11, %v376_v42  ;;  %731 = vrot.lane.b32.xlu1 %v4072_v43, %s3732_s26  ;;  %v4084_v53 = vld [vmem:[#allocation2 + $0x24] sm:$0xf] }
  0xe8   : > { %v2200_v54 = vrot.slane %v4072_v43, 5  ;;  %v2179_v58 = vld [vmem:[#allocation2 + $0x24] sm:$0xe]  ;;  %v458_v4 = vpack.i.b16 %v4084_v53, %v4087_v56  ;;  %vm699_vm11 = vcmask 916480  }
  0xe9   : > { %v3390_v6 = vrot.slane %v2179_v58, 9 }
  0xea   : > { %v396_v46 = vpop.permute.xlu1 %395  ;;  %v390_v47 = vpop.permute.xlu0 %389  ;;  %v4078_v48 = vld [vmem:[#allocation2 + $0x1c] sm:$0xf]  ;;  %v4111_v5 = vsel %vm4090_vm1, %v3388_v59, %v2200_v54  ;;  %v2202_v9 = vrot.slane %v2200_v54, 4 }
  0xeb   : > { %v440_v51 = vsel %vm4052_vm14, %v396_v46, %v439_v44  ;;  %v433_v52 = vsel %vm4052_vm14, %v390_v47, %v432_v45  ;;  %v2207_v61 = vrot.slane %v4078_v48, 5  ;;  %v4097_v62 = vld [vmem:[#allocation2 + $0x8] sm:$0x1]  ;;  %v2223_v15 = vshrl.u32 %v4111_v5, 16 }
  0xec   : > { %441 = vst [vmem:[#allocation2 + $0x2c] sm:$0x1] %v440_v51  ;;  %434 = vst [vmem:[#allocation2 + $0x20] sm:$0x1] %v433_v52  ;;  %v2196_v11 = vrot.slane %v4097_v62, 5  ;;  %v4147_v22 = vsel %vm4090_vm1, %v2202_v9, %v2203_v10  ;;  %v4191_v44 = vrot.slane %v452_v37, %v4170_v31  ;;  %v4194_v45 = vrot.slane %v458_v4, %v4170_v31 }
  0xed   : > { %v4127_v14 = vsel %vm4090_vm1, %v3389_v3, %v2207_v61  ;;  %v2209_v42 = vrot.slane %v2207_v61, 4  ;;  %vm3065_vm14 = vcmask 1045504  }
  0xee   : > { %v4099_v63 = vld [vmem:[#allocation2 + $0x28] sm:$0xf]  ;;  %v4101_v1 = vld [vmem:[#allocation2 + $0x4] sm:$0xf]  ;;  %v2228_v46 = vshrl.u32 %v4127_v14, 16  ;;  %v490_v37 = vcombine.low %v4191_v44, %v4194_v45  ;;  %v491_v55 = vcombine.high %v4191_v44, %v4194_v45 }
  0xef   : > { %739 = vrot.lane.b32.xlu1 %v4099_v63, %s3732_s26  ;;  %727 = vrot.lane.b32.xlu0 %v4101_v1, %s3732_s26  ;;  %v2214_v7 = vrot.slane %v4099_v63, 5  ;;  %v2193_v8 = vrot.slane %v4101_v1, 5  ;;  %v464_v20 = vpack.i.b16 %v4072_v43, %v4101_v1  ;;  %v470_v32 = vpack.i.b16 %v4099_v63, %v4078_v48 }
  0xf0   : > { %v472_v27 = vshrl.u32 %v4099_v63, 16 }
  0xf1   : > { %v4119_v12 = vsel %vm4090_vm1, %v3390_v6, %v2214_v7  ;;  %v4123_v13 = vsel %vm4090_vm1, %v3387_v2, %v2193_v8  ;;  %v2195_v0 = vrot.slane %v2193_v8, 4  ;;  %v2216_v33 = vrot.slane %v2214_v7, 4 }
  0xf2   : > { %v2221_v16 = vpack.i.b16 %v4111_v5, %v4123_v13  ;;  %v2222_v17 = vshrl.u32 %v4123_v13, 16  ;;  %v2227_v18 = vpack.i.b16 %v4119_v12, %v4127_v14  ;;  %v4177_v39 = vrot.slane %v464_v20, %v4170_v31 }
  0xf3   : > { %735 = vrot.lane.b32.xlu0 %v4078_v48, %s3732_s26  ;;  %729 = vrot.lane.b32.xlu1 %v4063_v34, %s3732_s26  ;;  %v4141_v19 = vsel %vm4090_vm1, %v2195_v0, %v2196_v11  ;;  %v4161_v29 = vld [vmem:[#allocation2 + $0x2c] sm:$0x1]  ;;  %v4163_v30 = vld [vmem:[#allocation2 + $0x20] sm:$0x1]  ;;  %v2229_v40 = vshrl.u32 %v4119_v12, 16  ;;  %v4181_v41 = vrot.slane %v470_v32, %v4170_v31  ;;  %v2235_v8 = vshrl.u32 %v4147_v22, 16 }
  0xf4   : > { %v2224_v21 = vpack.i.b16 %v2223_v15, %v2222_v17  ;;  %v2233_v23 = vpack.i.b16 %v4147_v22, %v4141_v19  ;;  %v2217_v36 = vrot.slane %v4161_v29, 5  ;;  %v2210_v38 = vrot.slane %v4163_v30, 5 }
  0xf5   : > { %v558_v47 = vcombine.low %v4177_v39, %v4181_v41  ;;  %v2230_v51 = vpack.i.b16 %v2229_v40, %v2228_v46  ;;  %v559_v52 = vcombine.high %v4177_v39, %v4181_v41  ;;  %v2234_v7 = vshrl.u32 %v4141_v19, 16 }
  0xf6   : > { %v4201_v49 = vsel %vm4090_vm1, %v2216_v33, %v2217_v36  ;;  %v4205_v50 = vsel %vm4090_vm1, %v2209_v42, %v2210_v38  ;;  %v4220_v57 = vrot.slane %v2224_v21, %v4170_v31  ;;  %v4235_v2 = vrot.slane %v2233_v23, %v4170_v31 }
  0xf7   : > { %737 = vrot.lane.b32.xlu1 %v4084_v53, %s3732_s26  ;;  %725 = vrot.lane.b32.xlu0 %v4065_v35, %s3732_s26  ;;  %v2239_v54 = vpack.i.b16 %v4201_v49, %v4205_v50  ;;  %v4223_v58 = vrot.slane %v2230_v51, %v4170_v31  ;;  %v2241_v3 = vshrl.u32 %v4201_v49, 16  ;;  %v2240_v4 = vshrl.u32 %v4205_v50, 16 }
  0xf8   : > { %v4255_v10 = vrot.slane %v2221_v16, %v4170_v31  ;;  %v4261_v11 = vrot.slane %v2227_v18, %v4170_v31  ;;  %v2236_v0 = vpack.i.b16 %v2235_v8, %v2234_v7  ;;  %v466_v17 = vshrl.u32 %v4072_v43, 16 }
  0xf9   : > { %v4230_v59 = vrot.slane %v2239_v54, %v4170_v31  ;;  %v2293_v61 = vcombine.low %v4220_v57, %v4223_v58  ;;  %v2242_v9 = vpack.i.b16 %v2241_v3, %v2240_v4  ;;  %v1311_v16 = vshll.u32 %v4072_v43, 16 }
  0xfa   : > { %v2259_v20 = vcombine.low %v4255_v10, %v4261_v11  ;;  %v4275_v18 = vrot.slane %v2236_v0, %v4170_v31  ;;  %v1316_v25 = vrot.slane %v466_v17, 4  ;;  %v1351_v32 = vshll.u32 %v4099_v63, 16 }
  0xfb   : > { %1007 = vrot.lane.b32.xlu1 %v4072_v43, %s3734_s4  ;;  %733 = vrot.lane.b32.xlu0 %v4087_v56, %s3732_s26  ;;  %v2327_v6 = vcombine.low %v4235_v2, %v4230_v59  ;;  %v4268_v15 = vrot.slane %v2242_v9, %v4170_v31  ;;  %v2328_v21 = vcombine.high %v4235_v2, %v4230_v59  ;;  %v4287_v24 = vrot.slane %v1311_v16, 5 }
  0xfc   : > { %v1291_v33 = vshll.u32 %v4101_v1, 16  ;;  %v1306_v38 = vshll.u32 %v4063_v34, 16  ;;  %v471_v40 = vshrl.u32 %v4078_v48, 16  ;;  %v4304_v42 = vrot.slane %v1351_v32, 5 }
  0xfd   : > { %v1317_v36 = vor.u32 %v1316_v25, %v4287_v24  ;;  %v1356_v46 = vrot.slane %v472_v27, 4  ;;  %v1331_v3 = vshll.u32 %v4078_v48, 16  ;;  %v1360_v7 = vshll.u32 %v4161_v29, 16 }
  0xfe   : > { %v1293_v51 = vrot.slane %v1291_v33, 5  ;;  %v1308_v9 = vrot.slane %v1306_v38, 5  ;;  %v1336_v25 = vrot.slane %v471_v40, 4  ;;  %v1286_v29 = vshll.u32 %v4065_v35, 16 }
  0xff   : > { %1015 = vrot.lane.b32.xlu1 %v4099_v63, %s3734_s4  ;;  %1003 = vrot.lane.b32.xlu0 %v4101_v1, %s3734_s4  ;;  %v1318_v4 = vrot.slane %v1317_v36, 4  ;;  %v1357_v0 = vor.u32 %v1356_v46, %v4304_v42  ;;  %v460_v32 = vshrl.u32 %v4084_v53, 16  ;;  %v1300_v36 = vshll.u32 %v4097_v62, 16 }
 0x100   : > { %v1333_v38 = vrot.slane %v1331_v3, 5  ;;  %v1346_v46 = vshll.u32 %v4084_v53, 16  ;;  %v1340_v23 = vshll.u32 %v4163_v30, 16  ;;  %v1288_v62 = vrot.slane %v1286_v29, 5 }
 0x101   : > { %v1302_v3 = vrot.slane %v1300_v36, 5  ;;  %v473_v33 = vpack.i.b16 %v472_v27, %v471_v40 }
 0x102   : > { %v1337_v26 = vor.u32 %v1336_v25, %v1333_v38 }
 0x103   : > { %1005 = vrot.lane.b32.xlu1 %v4063_v34, %s3734_s4  ;;  %1011 = vrot.lane.b32.xlu0 %v4078_v48, %s3734_s4 }
 0x107   : > { %1013 = vrot.lane.b32.xlu1 %v4084_v53, %s3734_s4  ;;  %1001 = vrot.lane.b32.xlu0 %v4065_v35, %s3734_s4 }
 0x10b   : > { %2483 = vrot.lane.b32.xlu1 %v4111_v5, %s3732_s26  ;;  %1009 = vrot.lane.b32.xlu0 %v4087_v56, %s3734_s4 }
 0x10f   : > { %2491 = vrot.lane.b32.xlu1 %v4119_v12, %s3732_s26  ;;  %2479 = vrot.lane.b32.xlu0 %v4123_v13, %s3732_s26 }
 0x113   : > { %2485 = vrot.lane.b32.xlu1 %v4147_v22, %s3732_s26  ;;  %2487 = vrot.lane.b32.xlu0 %v4127_v14, %s3732_s26 }
 0x117   : > { %2493 = vrot.lane.b32.xlu1 %v4201_v49, %s3732_s26  ;;  %2755 = vrot.lane.b32.xlu0 %v4123_v13, %s3734_s4  ;;  %v459_v13 = vshrl.u32 %v4087_v56, 16 }
 0x11b   : > { %2757 = vrot.lane.b32.xlu1 %v4141_v19, %s3734_s4  ;;  %2759 = vrot.lane.b32.xlu0 %v4111_v5, %s3734_s4  ;;  %v465_v5 = vshrl.u32 %v4101_v1, 16  ;;  %v591_v1 = vrot.slane %v473_v33, %v4170_v31 }
 0x11d   : > { %v1296_v54 = vrot.slane %v465_v5, 4 }
 0x11f   : > { %2761 = vrot.lane.b32.xlu1 %v4147_v22, %s3734_s4  ;;  %2763 = vrot.lane.b32.xlu0 %v4127_v14, %s3734_s4  ;;  %v454_v22 = vshrl.u32 %v4063_v34, 16  ;;  %v1320_v14 = vshll.u32 %v4094_v60, 16  ;;  %v1297_v16 = vor.u32 %v1296_v54, %v1293_v51 }
 0x121   : > { %v1305_v8 = vrot.slane %v454_v22, 4  ;;  %v1322_v60 = vrot.slane %v1320_v14, 5  ;;  %v1298_v14 = vrot.slane %v1297_v16, 4  ;;  %v1342_v16 = vrot.slane %v1340_v23, 5 }
 0x123   : > { %2765 = vrot.lane.b32.xlu1 %v4205_v50, %s3734_s4  ;;  %2767 = vrot.lane.b32.xlu0 %v4119_v12, %s3734_s4  ;;  %v453_v12 = vshrl.u32 %v4065_v35, 16  ;;  %v1309_v54 = vor.u32 %v1308_v9, %v1305_v8  ;;  %v1358_v35 = vrot.slane %v1357_v0, 4  ;;  %v4355_v30 = vsel %vm4332_vm4, %v1298_v14, %v1302_v3 }
 0x124   : > { %v1338_v0 = vrot.slane %v1337_v26, 4 }
 0x125   : > { %v1285_v53 = vrot.slane %v453_v12, 4  ;;  %v1310_v8 = vrot.slane %v1309_v54, 4  ;;  %v455_v43 = vpack.i.b16 %v454_v22, %v453_v12 }
 0x127   : > { %2769 = vrot.lane.b32.xlu1 %v4201_v49, %s3734_s4  ;;  %2481 = vrot.lane.b32.xlu0 %v4141_v19, %s3732_s26  ;;  %v4340_v49 = vsel %vm4332_vm4, %v1318_v4, %v1322_v60  ;;  %v1362_v19 = vrot.slane %v1360_v7, 5  ;;  %v1345_v4 = vrot.slane %v460_v32, 4  ;;  %v1348_v60 = vrot.slane %v1346_v46, 5 }
 0x128   : > { %v1326_v7 = vshll.u32 %v4087_v56, 16  ;;  %v1289_v25 = vor.u32 %v1288_v62, %v1285_v53  ;;  %v1325_v56 = vrot.slane %v459_v13, 4  ;;  %v4364_v36 = vsel %vm4332_vm4, %v1310_v8, %v4287_v24 }
 0x129   : > { %v4351_v9 = vsel %vm4332_vm4, %v1358_v35, %v1362_v19  ;;  %v4368_v46 = vsel %vm4332_vm4, %v1338_v0, %v1342_v16  ;;  %v467_v53 = vpack.i.b16 %v466_v17, %v465_v5  ;;  %v461_v62 = vpack.i.b16 %v460_v32, %v459_v13 }
 0x12a   : > { %v1328_v29 = vrot.slane %v1326_v7, 5  ;;  %v1290_v26 = vrot.slane %v1289_v25, 4  ;;  %v4428_v13 = vrot.slane %v455_v43, %v4170_v31  ;;  %v1379_v7 = vshrl.u32 %v4355_v30, 16 }
 0x12b   : > { %1906 = vrot.lane.b32.xlu1 %v4340_v49, %s3734_s4  ;;  %2489 = vrot.lane.b32.xlu0 %v4205_v50, %s3732_s26  ;;  %v1349_v50 = vor.u32 %v1348_v60, %v1345_v4  ;;  %v583_v3 = vrot.slane %v467_v53, %v4170_v31  ;;  %v4419_v63 = vrot.slane %v461_v62, %v4170_v31  ;;  %v1386_v4 = vshrl.u32 %v4351_v9, 16 }
 0x12c   : > { %v1329_v19 = vor.u32 %v1328_v29, %v1325_v56  ;;  %v4381_v24 = vsel %vm4332_vm4, %v1290_v26, %v1293_v51  ;;  %v1378_v60 = vpack.i.b16 %v4340_v49, %v4355_v30  ;;  %v1384_v8 = vpack.i.b16 %v4351_v9, %v4368_v46 }
 0x12d   : > { %v1350_v23 = vrot.slane %v1349_v50, 4  ;;  %v592_v34 = vcombine.low %v583_v3, %v591_v1  ;;  %v1385_v39 = vshrl.u32 %v4368_v46, 16  ;;  %v1368_v33 = vshrl.u32 %v4364_v36, 16 }
 0x12e   : > { %v1330_v35 = vrot.slane %v1329_v19, 4  ;;  %v4481_v50 = vrot.slane %v1378_v60, %v4170_v31  ;;  %v4484_v56 = vrot.slane %v1384_v8, %v4170_v31 }
 0x12f   : > { %1914 = vrot.lane.b32.xlu1 %v4351_v9, %s3734_s4  ;;  %1902 = vrot.lane.b32.xlu0 %v4355_v30, %s3734_s4  ;;  %v4377_v54 = vsel %vm4332_vm4, %v1350_v23, %v4304_v42  ;;  %v3735_v42 = vmov 1934713408   ;;  %v1387_v25 = vpack.i.b16 %v1386_v4, %v1385_v39  ;;  %v1367_v23 = vshrl.u32 %v4381_v24, 16 }
 0x130   : > { %v4389_v14 = vsel %vm4332_vm4, %v1330_v35, %v1333_v38  ;;  %v493_v51 = vunpack.c.l.s4 %v3735_v42  ;;  %v1374_v29 = vshrl.u32 %v4377_v54, 16  ;;  %v1472_v19 = vcombine.low %v4481_v50, %v4484_v56 }
 0x131   : > { %v1372_v26 = vpack.i.b16 %v4377_v54, %v4389_v14  ;;  %v525_v35 = vcombine.high %v4428_v13, %v4419_v63  ;;  %v1505_v53 = vrot.slane %v1387_v25, %v4170_v31 }
 0x132   : > { %v494_v38 = vunpack.c.0.s8 %v493_v51 }
 0x133   : > { %1904 = vrot.lane.b32.xlu1 %v4364_v36, %s3734_s4  ;;  %1910 = vrot.lane.b32.xlu0 %v4368_v46, %s3734_s4 }
 0x134   : > { %v4416_v48 = vsub.s32 %v494_v38, %v4159_v28  ;;  %v524_v28 = vcombine.low %v4428_v13, %v4419_v63  ;;  %v1373_v38 = vshrl.u32 %v4389_v14, 16 }
 0x136   : > { %v4425_v17 = vrot.slane %v558_v47, %v4416_v48  ;;  %v600_v5 = vrot.slane %v592_v34, %v4416_v48  ;;  %v4443_v47 = vrot.slane %v490_v37, %v4416_v48  ;;  %v532_v40 = vrot.slane %v524_v28, %v4416_v48 }
 0x137   : > { %1912 = vrot.lane.b32.xlu1 %v4377_v54, %s3734_s4  ;;  %1900 = vrot.lane.b32.xlu0 %v4381_v24, %s3734_s4  ;;  %v4455_v32 = vrot.slane %v559_v52, %v4416_v48  ;;  %v593_v37 = vcombine.high %v583_v3, %v591_v1  ;;  %v4475_v16 = vrot.slane %v491_v55, %v4416_v48 }
 0x138   : > { %5710 = vst [vmem:[#allocation12_spill] sm:$0xff] %v4425_v17  ;;  %v3454_v27 = vcombine.high %v4425_v17, %v4425_v17  ;;  %5711 = vst [vmem:[#allocation13_spill] sm:$0xff] %v4443_v47  ;;  %v3455_v22 = vcombine.high %v600_v5, %v600_v5  ;;  %v3450_v12 = vcombine.high %v4443_v47, %v4443_v47 }
 0x139   : > { %v3451_v41 = vcombine.high %v532_v40, %v532_v40  ;;  %v3313_v52 = vcombine.low %v4455_v32, %v4455_v32  ;;  %v4469_v0 = vrot.slane %v593_v37, %v4416_v48  ;;  %v3306_v45 = vcombine.low %v4475_v16, %v4475_v16 }
 0x13a   : > { %v4494_v55 = vrot.slane %v2293_v61, %v4416_v48  ;;  %v3310_v61 = vcombine.low %v600_v5, %v600_v5  ;;  %v1369_v3 = vpack.i.b16 %v1368_v33, %v1367_v23  ;;  %v1403_v1 = vrot.slane %v1372_v26, %v4170_v31 }
 0x13b   : > { %1630 = vrot.lane.b32.xlu1 %v4340_v49, %s3732_s26  ;;  %1908 = vrot.lane.b32.xlu0 %v4389_v14, %s3734_s4  ;;  %v3314_v44 = vcombine.low %v4469_v0, %v4469_v0  ;;  %v4526_v43 = vrot.slane %v1472_v19, %v4416_v48  ;;  %v4529_v63 = vrot.slane %v525_v35, %v4416_v48  ;;  %s3743_s4 = smov [#allocation8]  }
 0x13c   : > { %v3391_v42 = vcombine.low %v4494_v55, %v4494_v55  ;;  %v3303_v34 = vcombine.low %v532_v40, %v532_v40  ;;  %v4548_v40 = vrot.slane %v2327_v6, %v4416_v48  ;;  %v1429_v4 = vrot.slane %v1369_v3, %v4170_v31 }
 0x13d   : > { %5712 = vst [vmem:[#allocation14_spill] sm:$0xff] %v4526_v43  ;;  %v3478_v28 = vcombine.high %v4526_v43, %v4526_v43 }
 0x13e   : > { %5713 = vst [vmem:[#allocation15_spill] sm:$0xff] %v4548_v40  ;;  %v3502_v6 = vcombine.high %v4548_v40, %v4548_v40 }
 0x13f   : > { %1638 = vrot.lane.b32.xlu1 %v4351_v9, %s3732_s26  ;;  %1626 = vrot.lane.b32.xlu0 %v4355_v30, %s3732_s26  ;;  %v1380_v30 = vshrl.u32 %v4340_v49, 16  ;;  %v2361_v49 = vcombine.low %v4275_v18, %v4268_v15 }
 0x141   : > { %v1381_v9 = vpack.i.b16 %v1380_v30, %v1379_v7  ;;  %v1473_v30 = vcombine.high %v4481_v50, %v4484_v56 }
 0x143   : > { %1628 = vrot.lane.b32.xlu1 %v4364_v36, %s3732_s26  ;;  %1634 = vrot.lane.b32.xlu0 %v4368_v46, %s3732_s26  ;;  %v1366_v46 = vpack.i.b16 %v4364_v36, %v4381_v24  ;;  %v1497_v51 = vrot.slane %v1381_v9, %v4170_v31  ;;  %v1375_v36 = vpack.i.b16 %v1374_v29, %v1373_v38 }
 0x145   : > { %v1506_v13 = vcombine.low %v1497_v51, %v1505_v53  ;;  %v1437_v60 = vrot.slane %v1375_v36, %v4170_v31  ;;  %v1507_v25 = vcombine.high %v1497_v51, %v1505_v53 }
 0x147   : > { %1636 = vrot.lane.b32.xlu1 %v4377_v54, %s3732_s26  ;;  %1624 = vrot.lane.b32.xlu0 %v4381_v24, %s3732_s26  ;;  %v4513_v24 = vrot.slane %v2361_v49, %v4416_v48  ;;  %v1395_v54 = vrot.slane %v1366_v46, %v4170_v31  ;;  %v1514_v37 = vrot.slane %v1506_v13, %v4416_v48 }
 0x148   : > { %v1487_v46 = vrot.slane %v1473_v30, %v4416_v48  ;;  %v4582_v19 = vrot.slane %v1507_v25, %v4416_v48 }
 0x149   : > { %v1404_v5 = vcombine.low %v1395_v54, %v1403_v1  ;;  %v3479_v49 = vcombine.high %v1514_v37, %v1514_v37  ;;  %v1405_v23 = vcombine.high %v1395_v54, %v1403_v1  ;;  %v1439_v54 = vcombine.high %v1429_v4, %v1437_v60 }
 0x14a   : > { %v3356_v53 = vcombine.low %v4582_v19, %v4582_v19  ;;  %v3456_v1 = vcombine.high %v4455_v32, %v4455_v32  ;;  %v4620_v32 = vrot.slane %v2259_v20, %v4416_v48  ;;  %v3503_v20 = vcombine.high %v4513_v24, %v4513_v24 }
 0x14b   : > { %653 = vrot.lane.b32.xlu1 %v3454_v27, %s3736_s7  ;;  %1632 = vrot.lane.b32.xlu0 %v4389_v14, %s3732_s26  ;;  %v3398_v14 = vcombine.low %v4513_v24, %v4513_v24  ;;  %v3307_v27 = vcombine.low %v4529_v63, %v4529_v63  ;;  %v4555_v7 = vrot.slane %v1404_v5, %v4416_v48  ;;  %s3654_s26 = scalar_lea.vmem %s3177_s17, 128 }
 0x14c   : > { %v4585_v35 = vrot.slane %v1405_v23, %v4416_v48  ;;  %5715 = vst [vmem:[#allocation17_spill] sm:$0xff] %v4620_v32  ;;  %p3655_p9 = scmp.ne.s32.totalorder %s3177_s17, %s3654_s26 }
 0x14d   : > { %5714 = vst [vmem:[#allocation16_spill] sm:$0xff] %v4555_v7  ;;  %v3474_v9 = vcombine.high %v4555_v7, %v4555_v7 }
 0x14e   : > { %v3348_v33 = vcombine.low %v4585_v35, %v4585_v35  ;;  %p3656_p2 = pnand %p3655_p9, %p5792_p10 }
 0x14f   : > { %658 = vrot.lane.b32.xlu1 %v3455_v22, %s3737_s10  ;;  %618 = vrot.lane.b32.xlu0 %v3450_v12, %s3736_s7 }
 0x150   : > { %p3657_p4 = pneg %p3656_p2 }
 0x153   : > { %623 = vrot.lane.b32.xlu1 %v3451_v41, %s3737_s10  ;;  %663 = vrot.lane.b32.xlu0 %v3313_v52, %s3738_s29  ;;  %v3352_v41 = vcombine.low %v1514_v37, %v1514_v37  ;;  %v1438_v52 = vcombine.low %v1429_v4, %v1437_v60 }
 0x155   : > { %v1446_v29 = vrot.slane %v1438_v52, %v4416_v48 }
 0x157   : > { %668 = vrot.lane.b32.xlu1 %v3314_v44, %s3739_s19  ;;  %628 = vrot.lane.b32.xlu0 %v3306_v45, %s3738_s29  ;;  %v3475_v26 = vcombine.high %v1446_v29, %v1446_v29  ;;  %v3345_v36 = vcombine.low %v1446_v29, %v1446_v29  ;;  %v3452_v29 = vcombine.high %v4475_v16, %v4475_v16 }
 0x159   : > { %v4522_v62 = vpop.permute.xlu1 %731 }
 0x15b   : > { %2382 = vrot.lane.b32.xlu1 %v3391_v42, %s3740_s20  ;;  %648 = vrot.lane.b32.xlu0 %v3310_v61, %s3740_s20  ;;  %v3355_v61 = vcombine.low %v1487_v46, %v1487_v46 }
 0x15f   : > { %2417 = vrot.lane.b32.xlu1 %v3398_v14, %s3740_s20  ;;  %613 = vrot.lane.b32.xlu0 %v3303_v34, %s3740_s20  ;;  %v4606_v14 = vrot.slane %v1439_v54, %v4416_v48 }
 0x161   : > { %v4539_v22 = vpop.permute.xlu1 %739  ;;  %v4541_v12 = vpop.permute.xlu0 %727 }
 0x163   : > { %1567 = vrot.lane.b32.xlu1 %v3478_v28, %s3736_s7  ;;  %633 = vrot.lane.b32.xlu0 %v3307_v27, %s3739_s19  ;;  %v3349_v28 = vcombine.low %v4606_v14, %v4606_v14  ;;  %v3480_v27 = vcombine.high %v1487_v46, %v1487_v46  ;;  %v3457_v46 = vcombine.high %v4469_v0, %v4469_v0 }
 0x164   : > { %v3476_v0 = vcombine.high %v4585_v35, %v4585_v35  ;;  %v4675_v35 = vrot.slane %v2328_v21, %v4416_v48 }
 0x165   : > { %v4557_v8 = vpop.permute.xlu0 %735  ;;  %v4559_v39 = vpop.permute.xlu1 %729 }
 0x166   : > { %v761_v5 = vpack.i.b16 %v4539_v22, %v4557_v8 }
 0x167   : > { %1562 = vrot.lane.b32.xlu1 %v3352_v41, %s3740_s20  ;;  %2422 = vrot.lane.b32.xlu0 %v3502_v6, %s3736_s7  ;;  %v3498_v41 = vcombine.high %v4620_v32, %v4620_v32  ;;  %v755_v6 = vpack.i.b16 %v4522_v62, %v4541_v12 }
 0x168   : > { %v848_v30 = vrot.slane %v761_v5, %v4170_v31 }
 0x169   : > { %v4569_v44 = vpop.permute.xlu1 %737  ;;  %v4571_v45 = vpop.permute.xlu0 %725  ;;  %v840_v23 = vrot.slane %v755_v6, %v4170_v31 }
 0x16a   : > { %v743_v52 = vpack.i.b16 %v4559_v39, %v4571_v45 }
 0x16b   : > { %1572 = vrot.lane.b32.xlu1 %v3479_v49, %s3737_s10  ;;  %1532 = vrot.lane.b32.xlu0 %v3474_v9, %s3736_s7  ;;  %v849_v16 = vcombine.low %v840_v23, %v848_v30  ;;  %v850_v6 = vcombine.high %v840_v23, %v848_v30  ;;  %v3401_v23 = vcombine.low %v4675_v35, %v4675_v35 }
 0x16d   : > { %v4577_v50 = vpop.permute.xlu1 %1007  ;;  %v4579_v56 = vpop.permute.xlu0 %733  ;;  %v4689_v21 = vrot.slane %v849_v16, %v4416_v48 }
 0x16e   : > { %v749_v37 = vpack.i.b16 %v4569_v44, %v4579_v56 }
 0x16f   : > { %1537 = vrot.lane.b32.xlu1 %v3475_v26, %s3737_s10  ;;  %1577 = vrot.lane.b32.xlu0 %v3355_v61, %s3738_s29  ;;  %v3481_v26 = vcombine.high %v4582_v19, %v4582_v19  ;;  %v4654_v61 = vrot.slane %v743_v52, %v4170_v31  ;;  %v3499_v19 = vcombine.high %v4494_v55, %v4494_v55 }
 0x170   : > { %v4642_v9 = vrot.slane %v749_v37, %v4170_v31  ;;  %5716 = vst [vmem:[#allocation18_spill] sm:$0xff] %v4689_v21 }
 0x171   : > { %v4589_v42 = vpop.permute.xlu1 %1015  ;;  %v4591_v51 = vpop.permute.xlu0 %1003 }
 0x173   : > { %1582 = vrot.lane.b32.xlu1 %v3356_v53, %s3739_s19  ;;  %1542 = vrot.lane.b32.xlu0 %v3348_v33, %s3738_s29  ;;  %v1031_v53 = vpack.i.b16 %v4577_v50, %v4591_v51 }
 0x175   : > { %v4599_v38 = vpop.permute.xlu1 %1005  ;;  %v4601_v3 = vpop.permute.xlu0 %1011  ;;  %v1116_v52 = vrot.slane %v1031_v53, %v4170_v31 }
 0x176   : > { %v1037_v25 = vpack.i.b16 %v4589_v42, %v4601_v3 }
 0x177   : > { %673 = vrot.lane.b32.xlu1 %v3456_v1, %s3741_s30  ;;  %1527 = vrot.lane.b32.xlu0 %v3345_v36, %s3740_s20  ;;  %v781_v36 = vcombine.low %v4654_v61, %v4642_v9 }
 0x179   : > { %v4610_v34 = vpop.permute.xlu1 %1013  ;;  %v4612_v13 = vpop.permute.xlu0 %1001 }
 0x17b   : > { %1547 = vrot.lane.b32.xlu1 %v3349_v28, %s3739_s19  ;;  %1587 = vrot.lane.b32.xlu0 %v3480_v27, %s3741_s30  ;;  %v1124_v28 = vrot.slane %v1037_v25, %v4170_v31  ;;  %v1019_v25 = vpack.i.b16 %v4599_v38, %v4612_v13 }
 0x17d   : > { %v2484_v4 = vpop.permute.xlu1 %2483  ;;  %v4628_v60 = vpop.permute.xlu0 %1009  ;;  %v1125_v30 = vcombine.low %v1116_v52, %v1124_v28  ;;  %v1048_v16 = vrot.slane %v1019_v25, %v4170_v31 }
 0x17e   : > { %v2499_v54 = vshrl.u32 %v2484_v4, 16  ;;  %v1025_v27 = vpack.i.b16 %v4610_v34, %v4628_v60 }
 0x17f   : > { %2387 = vrot.lane.b32.xlu1 %v3498_v41, %s3736_s7  ;;  %2427 = vrot.lane.b32.xlu0 %v3503_v20, %s3737_s10 }
 0x181   : > { %v2492_v49 = vpop.permute.xlu1 %2491  ;;  %v2480_v24 = vpop.permute.xlu0 %2479 }
 0x182   : > { %v2498_v33 = vshrl.u32 %v2480_v24, 16  ;;  %v2497_v1 = vpack.i.b16 %v2484_v4, %v2480_v24  ;;  %v2505_v4 = vshrl.u32 %v2492_v49, 16 }
 0x183   : > { %638 = vrot.lane.b32.xlu1 %v3452_v29, %s3741_s30  ;;  %678 = vrot.lane.b32.xlu0 %v3457_v46, %s3742_s22 }
 0x184   : > { %v2500_v41 = vpack.i.b16 %v2499_v54, %v2498_v33  ;;  %v4683_v24 = vrot.slane %v2497_v1, %v4170_v31  ;;  %v3462_v1 = vcombine.high %v4689_v21, %v4689_v21 }
 0x185   : > { %v4669_v5 = vpop.permute.xlu1 %2485  ;;  %v2488_v37 = vpop.permute.xlu0 %2487 }
 0x186   : > { %v2503_v55 = vpack.i.b16 %v2492_v49, %v2488_v37  ;;  %v2504_v20 = vshrl.u32 %v2488_v37, 16  ;;  %v1056_v49 = vrot.slane %v1025_v27, %v4170_v31  ;;  %v4702_v53 = vrot.slane %v2500_v41, %v4170_v31 }
 0x187   : > { %1592 = vrot.lane.b32.xlu1 %v3481_v26, %s3742_s22  ;;  %1552 = vrot.lane.b32.xlu0 %v3476_v0, %s3741_s30  ;;  %v4699_v26 = vrot.slane %v781_v36, %v4416_v48  ;;  %v4717_v36 = vrot.slane %v850_v6, %v4416_v48  ;;  %v1126_v27 = vcombine.high %v1116_v52, %v1124_v28  ;;  %v762_v6 = vshrl.u32 %v4557_v8, 16 }
 0x188   : > { %v2506_v59 = vpack.i.b16 %v2505_v4, %v2504_v20  ;;  %v4686_v2 = vrot.slane %v2503_v55, %v4170_v31  ;;  %v1057_v37 = vcombine.low %v1048_v16, %v1056_v49  ;;  %v763_v20 = vshrl.u32 %v4539_v22, 16 }
 0x189   : > { %v4692_v29 = vpop.permute.xlu1 %2493  ;;  %v4694_v46 = vpop.permute.xlu0 %2755  ;;  %5718 = vst [vmem:[#allocation20_spill] sm:$0xff] %v4699_v26  ;;  %v3458_v55 = vcombine.high %v4699_v26, %v4699_v26  ;;  %v750_v28 = vshrl.u32 %v4579_v56, 16  ;;  %v782_v52 = vcombine.high %v4654_v61, %v4642_v9  ;;  %v3327_v25 = vcombine.low %v4717_v36, %v4717_v36 }
 0x18a   : > { %5717 = vst [vmem:[#allocation19_spill] sm:$0xff] %v4694_v46  ;;  %v4707_v0 = vrot.slane %v2506_v59, %v4170_v31  ;;  %v1058_v59 = vcombine.high %v1048_v16, %v1056_v49  ;;  %v4745_v8 = vrot.slane %v1057_v37, %v4416_v48  ;;  %v756_v56 = vshrl.u32 %v4541_v12, 16 }
 0x18b   : > { %2432 = vrot.lane.b32.xlu1 %v3401_v23, %s3738_s29  ;;  %2392 = vrot.lane.b32.xlu0 %v3499_v19, %s3737_s10  ;;  %v4726_v19 = vrot.slane %v1125_v30, %v4416_v48  ;;  %v751_v9 = vshrl.u32 %v4569_v44, 16  ;;  %v744_v61 = vshrl.u32 %v4571_v45, 16  ;;  %v757_v49 = vshrl.u32 %v4522_v62, 16 }
 0x18c   : > { %5722 = vst [vmem:[#allocation24_spill] sm:$0xff] %v4745_v8  ;;  %v764_v16 = vpack.i.b16 %v763_v20, %v762_v6  ;;  %v1038_v37 = vshrl.u32 %v4601_v3, 16  ;;  %v3466_v62 = vcombine.high %v4745_v8, %v4745_v8  ;;  %v1072_v45 = vrot.slane %v1058_v59, %v4416_v48 }
 0x18d   : > { %v4719_v4 = vpop.permute.xlu1 %2757  ;;  %v4721_v41 = vpop.permute.xlu0 %2759  ;;  %5720 = vst [vmem:[#allocation22_spill] sm:$0xff] %v4726_v19  ;;  %v3470_v22 = vcombine.high %v4726_v19, %v4726_v19  ;;  %v752_v54 = vpack.i.b16 %v751_v9, %v750_v28  ;;  %v1032_v20 = vshrl.u32 %v4591_v51, 16  ;;  %v1033_v6 = vshrl.u32 %v4577_v50, 16 }
 0x18e   : > { %5719 = vst [vmem:[#allocation21_spill] sm:$0xff] %v4721_v41  ;;  %v4768_v3 = vrot.slane %v764_v16, %v4170_v31  ;;  %v1026_v59 = vshrl.u32 %v4628_v60, 16  ;;  %v1027_v50 = vshrl.u32 %v4610_v34, 16 }
 0x18f   : > { %909 = vrot.lane.b32.xlu1 %v3458_v55, %s3736_s7  ;;  %944 = vrot.lane.b32.xlu0 %v3462_v1, %s3736_s7  ;;  %v1140_v1 = vrot.slane %v1126_v27, %v4416_v48  ;;  %v745_v55 = vshrl.u32 %v4559_v39, 16  ;;  %v796_v27 = vrot.slane %v782_v52, %v4416_v48  ;;  %v1039_v39 = vshrl.u32 %v4589_v42, 16 }
 0x190   : > { %v4772_v28 = vrot.slane %v752_v54, %v4170_v31  ;;  %v3334_v42 = vcombine.low %v1072_v45, %v1072_v45  ;;  %v1034_v16 = vpack.i.b16 %v1033_v6, %v1032_v20  ;;  %v1020_v54 = vshrl.u32 %v4612_v13, 16 }
 0x191   : > { %v4737_v23 = vpop.permute.xlu1 %2761  ;;  %v4739_v30 = vpop.permute.xlu0 %2763  ;;  %v3341_v44 = vcombine.low %v1140_v1, %v1140_v1  ;;  %v1040_v52 = vpack.i.b16 %v1039_v39, %v1038_v37  ;;  %v3320_v9 = vcombine.low %v796_v27, %v796_v27  ;;  %v1028_v13 = vpack.i.b16 %v1027_v50, %v1026_v59 }
 0x192   : > { %5721 = vst [vmem:[#allocation23_spill] sm:$0xff] %v4739_v30  ;;  %v3472_v39 = vcombine.high %v1140_v1, %v1140_v1  ;;  %v1150_v6 = vrot.slane %v1034_v16, %v4170_v31 }
 0x193   : > { %954 = vrot.lane.b32.xlu1 %v3327_v25, %s3738_s29  ;;  %1220 = vrot.lane.b32.xlu0 %v3470_v22, %s3736_s7  ;;  %v758_v25 = vpack.i.b16 %v757_v49, %v756_v56  ;;  %v746_v22 = vpack.i.b16 %v745_v55, %v744_v61  ;;  %v1158_v34 = vrot.slane %v1040_v52, %v4170_v31 }
 0x194   : > { %v1090_v1 = vrot.slane %v1028_v13, %v4170_v31 }
 0x195   : > { %v4756_v33 = vpop.permute.xlu1 %2765  ;;  %v4758_v12 = vpop.permute.xlu0 %2767  ;;  %v4780_v61 = vrot.slane %v758_v25, %v4170_v31  ;;  %v4783_v49 = vrot.slane %v746_v22, %v4170_v31  ;;  %v2511_v25 = vshrl.u32 %v4669_v5, 16  ;;  %v1159_v50 = vcombine.low %v1150_v6, %v1158_v34 }
 0x197   : > { %1230 = vrot.lane.b32.xlu1 %v3341_v44, %s3738_s29  ;;  %1185 = vrot.lane.b32.xlu0 %v3466_v62, %s3736_s7  ;;  %v883_v60 = vcombine.low %v4780_v61, %v4768_v3  ;;  %v815_v37 = vcombine.low %v4783_v49, %v4772_v28  ;;  %v1021_v44 = vshrl.u32 %v4599_v38, 16  ;;  %v3464_v62 = vcombine.high %v4717_v36, %v4717_v36 }
 0x198   : > { %v3460_v36 = vcombine.high %v796_v27, %v796_v27 }
 0x199   : > { %v4775_v56 = vpop.permute.xlu1 %2769  ;;  %v4777_v51 = vpop.permute.xlu0 %2481  ;;  %v823_v52 = vrot.slane %v815_v37, %v4416_v48  ;;  %v891_v59 = vrot.slane %v883_v60, %v4416_v48 }
 0x19a   : > { %v2510_v55 = vshrl.u32 %v4777_v51, 16 }
 0x19b   : > { %1195 = vrot.lane.b32.xlu1 %v3334_v42, %s3738_s29  ;;  %919 = vrot.lane.b32.xlu0 %v3320_v9, %s3738_s29  ;;  %v1022_v42 = vpack.i.b16 %v1021_v44, %v1020_v54  ;;  %v2517_v9 = vshrl.u32 %v4692_v29, 16  ;;  %v3324_v60 = vcombine.low %v891_v59, %v891_v59  ;;  %v3459_v47 = vcombine.high %v823_v52, %v823_v52 }
 0x19c   : > { %v2512_v32 = vpack.i.b16 %v2511_v25, %v2510_v55  ;;  %v3468_v55 = vcombine.high %v1072_v45, %v1072_v45 }
 0x19d   : > { %v4799_v22 = vpop.permute.xlu1 %1906  ;;  %v4801_v20 = vpop.permute.xlu0 %2489  ;;  %v1082_v44 = vrot.slane %v1022_v42, %v4170_v31 }
 0x19e   : > { %v2516_v38 = vshrl.u32 %v4801_v20, 16  ;;  %v4817_v25 = vrot.slane %v2512_v32, %v4170_v31  ;;  %v1167_v32 = vrot.slane %v1159_v50, %v4416_v48  ;;  %v1160_v50 = vcombine.high %v1150_v6, %v1158_v34 }
 0x19f   : > { %1240 = vrot.lane.b32.xlu1 %v3472_v39, %s3741_s30  ;;  %964 = vrot.lane.b32.xlu0 %v3464_v62, %s3741_s30  ;;  %v1091_v37 = vcombine.low %v1082_v44, %v1090_v1  ;;  %v3317_v39 = vcombine.low %v823_v52, %v823_v52 }
 0x1a0   : > { %v2518_v40 = vpack.i.b16 %v2517_v9, %v2516_v38  ;;  %v3338_v9 = vcombine.low %v1167_v32, %v1167_v32  ;;  %v3463_v38 = vcombine.high %v891_v59, %v891_v59  ;;  %v816_v59 = vcombine.high %v4783_v49, %v4772_v28 }
 0x1a1   : > { %v4811_v16 = vpop.permute.xlu1 %1914  ;;  %v4813_v54 = vpop.permute.xlu0 %1902  ;;  %v1174_v6 = vrot.slane %v1160_v50, %v4416_v48 }
 0x1a2   : > { %v4820_v27 = vrot.slane %v2518_v40, %v4170_v31 }
 0x1a3   : > { %1205 = vrot.lane.b32.xlu1 %v3468_v55, %s3741_s30  ;;  %929 = vrot.lane.b32.xlu0 %v3460_v36, %s3741_s30  ;;  %v1099_v36 = vrot.slane %v1091_v37, %v4416_v48  ;;  %v884_v55 = vcombine.high %v4780_v61, %v4768_v3  ;;  %v3471_v61 = vcombine.high %v1167_v32, %v1167_v32 }
 0x1a4   : > { %v3342_v49 = vcombine.low %v1174_v6, %v1174_v6  ;;  %v2515_v32 = vpack.i.b16 %v4692_v29, %v4801_v20 }
 0x1a5   : > { %v4826_v13 = vpop.permute.xlu1 %1904  ;;  %v4828_v45 = vpop.permute.xlu0 %1910  ;;  %v898_v37 = vrot.slane %v884_v55, %v4416_v48  ;;  %v3467_v34 = vcombine.high %v1099_v36, %v1099_v36 }
 0x1a6   : > { %v1936_v29 = vpack.i.b16 %v4811_v16, %v4828_v45 }
 0x1a7   : > { %904 = vrot.lane.b32.xlu1 %v3317_v39, %s3740_s20  ;;  %939 = vrot.lane.b32.xlu0 %v3324_v60, %s3740_s20  ;;  %v3331_v60 = vcombine.low %v1099_v36, %v1099_v36  ;;  %v3328_v28 = vcombine.low %v898_v37, %v898_v37  ;;  %v2509_v36 = vpack.i.b16 %v4669_v5, %v4777_v51 }
 0x1a8   : > { %v3465_v20 = vcombine.high %v898_v37, %v898_v37  ;;  %v2535_v5 = vcombine.low %v4683_v24, %v4686_v2  ;;  %v2569_v51 = vcombine.low %v4702_v53, %v4707_v0 }
 0x1a9   : > { %v4833_v40 = vpop.permute.xlu1 %1912  ;;  %v4835_v42 = vpop.permute.xlu0 %1900 }
 0x1aa   : > { %v4916_v19 = vrot.slane %v2535_v5, %v4416_v48  ;;  %v1926_v17 = vshrl.u32 %v4833_v40, 16  ;;  %v1919_v21 = vshrl.u32 %v4835_v42, 16 }
 0x1ab   : > { %1215 = vrot.lane.b32.xlu1 %v3338_v9, %s3740_s20  ;;  %949 = vrot.lane.b32.xlu0 %v3463_v38, %s3737_s10  ;;  %v1092_v9 = vcombine.high %v1082_v44, %v1090_v1  ;;  %v830_v1 = vrot.slane %v816_v59, %v4416_v48  ;;  %v4875_v59 = vrot.slane %v2515_v32, %v4170_v31 }
 0x1ac   : > { %v1930_v32 = vpack.i.b16 %v4799_v22, %v4813_v54  ;;  %5726 = vst [vmem:[#allocation28_spill] sm:$0xff] %v4916_v19 }
 0x1ad   : > { %v4842_v62 = vpop.permute.xlu1 %1630  ;;  %v4844_v39 = vpop.permute.xlu0 %1908  ;;  %v1106_v44 = vrot.slane %v1092_v9, %v4416_v48  ;;  %v4886_v9 = vrot.slane %v2509_v36, %v4170_v31  ;;  %v2637_v36 = vcombine.low %v4817_v25, %v4820_v27 }
 0x1ae   : > { %v1925_v7 = vshrl.u32 %v4844_v39, 16 }
 0x1af   : > { %1180 = vrot.lane.b32.xlu1 %v3331_v60, %s3740_s20  ;;  %914 = vrot.lane.b32.xlu0 %v3459_v47, %s3737_s10  ;;  %v3321_v60 = vcombine.low %v830_v1, %v830_v1  ;;  %v2603_v37 = vcombine.low %v4886_v9, %v4875_v59 }
 0x1b1   : > { %v4851_v38 = vpop.permute.xlu1 %1638  ;;  %v4853_v3 = vpop.permute.xlu0 %1626  ;;  %v4931_v5 = vrot.slane %v2603_v37, %v4416_v48 }
 0x1b3   : > { %1225 = vrot.lane.b32.xlu1 %v3471_v61, %s3737_s10  ;;  %1190 = vrot.lane.b32.xlu0 %v3467_v34, %s3737_s10  ;;  %v3335_v61 = vcombine.low %v1106_v44, %v1106_v44  ;;  %5727 = vst [vmem:[#allocation29_spill] sm:$0xff] %v4931_v5 }
 0x1b5   : > { %v4858_v52 = vpop.permute.xlu1 %1628  ;;  %v4860_v47 = vpop.permute.xlu0 %1634 }
 0x1b6   : > { %v1660_v43 = vpack.i.b16 %v4851_v38, %v4860_v47 }
 0x1b7   : > { %959 = vrot.lane.b32.xlu1 %v3328_v28, %s3739_s19  ;;  %1235 = vrot.lane.b32.xlu0 %v3342_v49, %s3739_s19  ;;  %v3461_v49 = vcombine.high %v830_v1, %v830_v1  ;;  %v1924_v1 = vpack.i.b16 %v4833_v40, %v4844_v39  ;;  %v1918_v39 = vpack.i.b16 %v4826_v13, %v4835_v42 }
 0x1b8   : > { %v2645_v42 = vrot.slane %v2637_v36, %v4416_v48 }
 0x1b9   : > { %v4870_v55 = vpop.permute.xlu1 %1636  ;;  %v4872_v50 = vpop.permute.xlu0 %1624 }
 0x1ba   : > { %v1643_v8 = vshrl.u32 %v4872_v50, 16  ;;  %v1642_v30 = vpack.i.b16 %v4858_v52, %v4872_v50 }
 0x1bb   : > { %924 = vrot.lane.b32.xlu1 %v3321_v60, %s3739_s19  ;;  %1200 = vrot.lane.b32.xlu0 %v3335_v61, %s3739_s19  ;;  %v3473_v60 = vcombine.high %v1174_v6, %v1174_v6  ;;  %v4901_v61 = vrot.slane %v1936_v29, %v4170_v31  ;;  %v4913_v6 = vrot.slane %v2569_v51, %v4416_v48 }
 0x1bc   : > { %v4919_v29 = vrot.slane %v1930_v32, %v4170_v31  ;;  %v1927_v51 = vpack.i.b16 %v1926_v17, %v1925_v7  ;;  %v4936_v32 = vrot.slane %v1924_v1, %v4170_v31  ;;  %v3506_v17 = vcombine.high %v4916_v19, %v4916_v19 }
 0x1bd   : > { %v4888_v34 = vpop.permute.xlu1 %653  ;;  %v4890_v28 = vpop.permute.xlu0 %1632  ;;  %v3405_v37 = vcombine.low %v4913_v6, %v4913_v6  ;;  %v4952_v1 = vrot.slane %v1918_v39, %v4170_v31  ;;  %v3412_v39 = vcombine.low %v2645_v42, %v2645_v42  ;;  %v1644_v19 = vshrl.u32 %v4858_v52, 16 }
 0x1be   : > { %5723 = vst [vmem:[#allocation25_spill] sm:$0xff] %v4888_v34  ;;  %v2024_v40 = vcombine.low %v4919_v29, %v4901_v61  ;;  %v1661_v52 = vshrl.u32 %v4860_v47, 16  ;;  %v1662_v47 = vshrl.u32 %v4851_v38, 16 }
 0x1bf   : > { %969 = vrot.lane.b32.xlu1 %v3465_v20, %s3742_s22  ;;  %934 = vrot.lane.b32.xlu0 %v3461_v49, %s3742_s22  ;;  %v3469_v49 = vcombine.high %v1106_v44, %v1106_v44  ;;  %v1654_v44 = vpack.i.b16 %v4842_v62, %v4853_v3  ;;  %v1645_v41 = vpack.i.b16 %v1644_v19, %v1643_v8 }
 0x1c1   : > { %v4908_v34 = vpop.permute.xlu1 %658  ;;  %v4910_v20 = vpop.permute.xlu0 %618  ;;  %v4955_v36 = vrot.slane %v1654_v44, %v4170_v31  ;;  %v4969_v44 = vrot.slane %v2024_v40, %v4416_v48  ;;  %v1938_v40 = vshrl.u32 %v4811_v16, 16 }
 0x1c2   : > { %5724 = vst [vmem:[#allocation26_spill] sm:$0xff] %v4908_v34  ;;  %5725 = vst [vmem:[#allocation27_spill] sm:$0xff] %v4910_v20  ;;  %v1920_v34 = vshrl.u32 %v4826_v13, 16  ;;  %v4940_v13 = vrot.slane %v1660_v43, %v4170_v31  ;;  %v1649_v20 = vshrl.u32 %v4890_v28, 16  ;;  %v1650_v43 = vshrl.u32 %v4870_v55, 16 }
 0x1c3   : > { %1210 = vrot.lane.b32.xlu1 %v3469_v49, %s3742_s22  ;;  %1245 = vrot.lane.b32.xlu0 %v3473_v60, %s3742_s22  ;;  %5730 = vst [vmem:[#allocation32_spill] sm:$0xff] %v4969_v44 }
 0x1c4   : > { %v1921_v7 = vpack.i.b16 %v1920_v34, %v1919_v21  ;;  %v1956_v21 = vcombine.low %v4952_v1, %v4936_v32  ;;  %v4966_v34 = vrot.slane %v1927_v51, %v4170_v31  ;;  %v1937_v51 = vshrl.u32 %v4828_v45, 16 }
 0x1c5   : > { %v4943_v49 = vpop.permute.xlu1 %623  ;;  %v4945_v60 = vpop.permute.xlu0 %663 }
 0x1c6   : > { %5728 = vst [vmem:[#allocation30_spill] sm:$0xff] %v4943_v49  ;;  %5729 = vst [vmem:[#allocation31_spill] sm:$0xff] %v4945_v60  ;;  %v3510_v49 = vcombine.high %v4931_v5, %v4931_v5  ;;  %v1651_v60 = vpack.i.b16 %v1650_v43, %v1649_v20  ;;  %v4982_v26 = vrot.slane %v1921_v7, %v4170_v31  ;;  %v1655_v43 = vshrl.u32 %v4853_v3, 16 }
 0x1c7   : > { %2658 = vrot.lane.b32.xlu1 %v3405_v37, %s3740_s20  ;;  %2663 = vrot.lane.b32.xlu0 %v3506_v17, %s3736_s7  ;;  %v1748_v37 = vcombine.low %v4955_v36, %v4940_v13  ;;  %v1648_v17 = vpack.i.b16 %v4870_v55, %v4890_v28  ;;  %v3511_v55 = vcombine.high %v2645_v42, %v2645_v42  ;;  %v1932_v42 = vshrl.u32 %v4799_v22, 16 }
 0x1c8   : > { %v2025_v28 = vcombine.high %v4919_v29, %v4901_v61  ;;  %v1990_v45 = vcombine.low %v4982_v26, %v4966_v34  ;;  %v3494_v20 = vcombine.high %v4969_v44, %v4969_v44  ;;  %v4996_v16 = vrot.slane %v1956_v21, %v4416_v48 }
 0x1c9   : > { %v4976_v5 = vpop.permute.xlu1 %668  ;;  %v4978_v46 = vpop.permute.xlu0 %628  ;;  %v5000_v19 = vrot.slane %v1648_v17, %v4170_v31  ;;  %v5003_v8 = vrot.slane %v1651_v60, %v4170_v31  ;;  %v5010_v29 = vrot.slane %v1748_v37, %v4416_v48  ;;  %v1939_v7 = vpack.i.b16 %v1938_v40, %v1937_v51 }
 0x1ca   : > { %5731 = vst [vmem:[#allocation33_spill] sm:$0xff] %v4978_v46  ;;  %v5017_v21 = vrot.slane %v1642_v30, %v4170_v31  ;;  %v5020_v60 = vrot.slane %v1645_v41, %v4170_v31  ;;  %v3490_v22 = vcombine.high %v4996_v16, %v4996_v16  ;;  %v5029_v38 = vrot.slane %v2025_v28, %v4416_v48 }
 0x1cb   : > { %2693 = vrot.lane.b32.xlu1 %v3412_v39, %s3740_s20  ;;  %2698 = vrot.lane.b32.xlu0 %v3510_v49, %s3736_s7  ;;  %5733 = vst [vmem:[#allocation35_spill] sm:$0xff] %v5010_v29  ;;  %v1931_v49 = vshrl.u32 %v4813_v54, 16  ;;  %v1656_v39 = vshrl.u32 %v4842_v62, 16  ;;  %v1998_v54 = vrot.slane %v1990_v45, %v4416_v48  ;;  %v1663_v3 = vpack.i.b16 %v1662_v47, %v1661_v52 }
 0x1cc   : > { %v1680_v30 = vcombine.low %v5017_v21, %v5000_v19  ;;  %v1714_v41 = vcombine.low %v5020_v60, %v5003_v8  ;;  %v3486_v62 = vcombine.high %v5010_v29, %v5010_v29  ;;  %v1957_v28 = vcombine.high %v4952_v1, %v4936_v32 }
 0x1cd   : > { %v5005_v50 = vpop.permute.xlu1 %2382  ;;  %v5007_v61 = vpop.permute.xlu0 %648  ;;  %v1933_v51 = vpack.i.b16 %v1932_v42, %v1931_v49  ;;  %v1657_v40 = vpack.i.b16 %v1656_v39, %v1655_v43  ;;  %v3383_v45 = vcombine.low %v5029_v38, %v5029_v38  ;;  %v3373_v42 = vcombine.low %v1998_v54, %v1998_v54 }
 0x1ce   : > { %5732 = vst [vmem:[#allocation34_spill] sm:$0xff] %v5005_v50  ;;  %v1722_v49 = vrot.slane %v1714_v41, %v4416_v48  ;;  %v5057_v43 = vrot.slane %v1680_v30, %v4416_v48 }
 0x1cf   : > { %2703 = vrot.lane.b32.xlu1 %v3511_v55, %s3737_s10  ;;  %2119 = vrot.lane.b32.xlu0 %v3494_v20, %s3736_s7  ;;  %v2057_v55 = vrot.slane %v1939_v7, %v4170_v31  ;;  %v5049_v20 = vrot.slane %v1663_v3, %v4170_v31  ;;  %v2049_v7 = vrot.slane %v1933_v51, %v4170_v31 }
 0x1d0   : > { %v5061_v32 = vrot.slane %v1657_v40, %v4170_v31  ;;  %v3359_v41 = vcombine.low %v1722_v49, %v1722_v49  ;;  %v3482_v30 = vcombine.high %v5057_v43, %v5057_v43 }
 0x1d1   : > { %v5035_v37 = vpop.permute.xlu1 %2417  ;;  %v5037_v17 = vpop.permute.xlu0 %613  ;;  %v2058_v1 = vcombine.low %v2049_v7, %v2057_v55  ;;  %v2059_v51 = vcombine.high %v2049_v7, %v2057_v55 }
 0x1d2   : > { %5734 = vst [vmem:[#allocation36_spill] sm:$0xff] %v5035_v37  ;;  %5735 = vst [vmem:[#allocation37_spill] sm:$0xff] %v5037_v17  ;;  %v1782_v39 = vcombine.low %v5061_v32, %v5049_v20 }
 0x1d3   : > { %2084 = vrot.lane.b32.xlu1 %v3490_v22, %s3736_s7  ;;  %1843 = vrot.lane.b32.xlu0 %v3486_v62, %s3736_s7  ;;  %v5074_v62 = vrot.slane %v1957_v28, %v4416_v48  ;;  %v2066_v37 = vrot.slane %v2058_v1, %v4416_v48 }
 0x1d5   : > { %v5051_v52 = vpop.permute.xlu1 %1567  ;;  %v5053_v47 = vpop.permute.xlu0 %633  ;;  %v3376_v50 = vcombine.low %v5074_v62, %v5074_v62  ;;  %v3380_v7 = vcombine.low %v2066_v37, %v2066_v37 }
 0x1d6   : > { %5736 = vst [vmem:[#allocation38_spill] sm:$0xff] %v5053_v47 }
 0x1d7   : > { %2079 = vrot.lane.b32.xlu1 %v3373_v42, %s3740_s20  ;;  %2129 = vrot.lane.b32.xlu0 %v3383_v45, %s3738_s29  ;;  %v3491_v42 = vcombine.high %v1998_v54, %v1998_v54  ;;  %v1749_v54 = vcombine.high %v4955_v36, %v4940_v13  ;;  %v1991_v36 = vcombine.high %v4982_v26, %v4966_v34 }
 0x1d8   : > { %v2604_v26 = vcombine.high %v4886_v9, %v4875_v59  ;;  %v1783_v59 = vcombine.high %v5061_v32, %v5049_v20 }
 0x1d9   : > { %v5067_v22 = vpop.permute.xlu1 %1562  ;;  %v5069_v3 = vpop.permute.xlu0 %2422  ;;  %v5110_v13 = vrot.slane %v1749_v54, %v4416_v48 }
 0x1da   : > { %5737 = vst [vmem:[#allocation39_spill] sm:$0xff] %v5069_v3  ;;  %v1790_v3 = vrot.slane %v1782_v39, %v4416_v48 }
 0x1db   : > { %1803 = vrot.lane.b32.xlu1 %v3359_v41, %s3740_s20  ;;  %1808 = vrot.lane.b32.xlu0 %v3482_v30, %s3736_s7  ;;  %v2073_v30 = vrot.slane %v2059_v51, %v4416_v48 }
 0x1dc   : > { %v3487_v55 = vcombine.high %v1790_v3, %v1790_v3 }
 0x1dd   : > { %v5078_v40 = vpop.permute.xlu1 %1572  ;;  %v5080_v45 = vpop.permute.xlu0 %1532 }
 0x1de   : > { %5738 = vst [vmem:[#allocation40_spill] sm:$0xff] %v5080_v45 }
 0x1df   : > { %2089 = vrot.lane.b32.xlu1 %v3491_v42, %s3737_s10  ;;  %2094 = vrot.lane.b32.xlu0 %v3376_v50, %s3738_s29  ;;  %v3384_v50 = vcombine.low %v2073_v30, %v2073_v30  ;;  %v3366_v42 = vcombine.low %v1790_v3, %v1790_v3 }
 0x1e1   : > { %v5088_v28 = vpop.permute.xlu1 %1537  ;;  %v5090_v41 = vpop.permute.xlu0 %1577 }
 0x1e2   : > { %5739 = vst [vmem:[#allocation41_spill] sm:$0xff] %v5088_v28 }
 0x1e3   : > { %1848 = vrot.lane.b32.xlu1 %v3487_v55, %s3737_s10  ;;  %2114 = vrot.lane.b32.xlu0 %v3380_v7, %s3740_s20  ;;  %v3477_v55 = vcombine.high %v4606_v14, %v4606_v14  ;;  %v3495_v7 = vcombine.high %v2066_v37, %v2066_v37  ;;  %v3453_v14 = vcombine.high %v4529_v63, %v4529_v63 }
 0x1e4   : > { %v5742_v37 = vcombine.high %v4275_v18, %v4268_v15  ;;  %v3496_v63 = vcombine.high %v5029_v38, %v5029_v38  ;;  %v5745_v15 = vcombine.high %v4255_v10, %v4261_v11  ;;  %v1681_v10 = vcombine.high %v5017_v21, %v5000_v19 }
 0x1e5   : > { %v5097_v1 = vpop.permute.xlu1 %1582  ;;  %v5099_v39 = vpop.permute.xlu0 %1542  ;;  %v3507_v21 = vcombine.high %v4913_v6, %v4913_v6  ;;  %v3504_v6 = vcombine.high %v4675_v35, %v4675_v35  ;;  %v1715_v35 = vcombine.high %v5020_v60, %v5003_v8  ;;  %v3488_v60 = vcombine.high %v5110_v13, %v5110_v13 }
 0x1e6   : > { %5740 = vst [vmem:[#allocation42_spill] sm:$0xff] %v5099_v39  ;;  %v5130_v54 = vrot.slane %v5742_v37, %v4416_v48  ;;  %v2274_v18 = vrot.slane %v5745_v15, %v4416_v48  ;;  %v1695_v15 = vrot.slane %v1681_v10, %v4416_v48  ;;  %v3492_v10 = vcombine.high %v5074_v62, %v5074_v62 }
 0x1e7   : > { %2134 = vrot.lane.b32.xlu1 %v3384_v50, %s3739_s19  ;;  %1838 = vrot.lane.b32.xlu0 %v3366_v42, %s3740_s20  ;;  %v3369_v42 = vcombine.low %v5110_v13, %v5110_v13  ;;  %v5753_v13 = vcombine.high %v4702_v53, %v4707_v0  ;;  %v2787_v53 = vshrl.u32 %v4737_v23, 16  ;;  %v2792_v0 = vshrl.u32 %v4756_v33, 16 }
 0x1e8   : > { %v3402_v38 = vcombine.low %v5130_v54, %v5130_v54  ;;  %v3394_v37 = vcombine.low %v2274_v18, %v2274_v18 }
 0x1e9   : > { %v5103_v29 = vpop.permute.xlu1 %673  ;;  %v5105_v51 = vpop.permute.xlu0 %1527 }
 0x1eb   : > { %1557 = vrot.lane.b32.xlu1 %v3477_v55, %s3742_s22  ;;  %2124 = vrot.lane.b32.xlu0 %v3495_v7, %s3737_s10  ;;  %v3483_v7 = vcombine.high %v1722_v49, %v1722_v49 }
 0x1ed   : > { %v5116_v3 = vpop.permute.xlu1 %1547  ;;  %v5118_v50 = vpop.permute.xlu0 %1587 }
 0x1ee   : > { %5741 = vst [vmem:[#allocation43_spill] sm:$0xff] %v5116_v3 }
 0x1ef   : > { %1853 = vrot.lane.b32.xlu1 %v3369_v42, %s3738_s29  ;;  %643 = vrot.lane.b32.xlu0 %v3453_v14, %s3742_s22  ;;  %v5141_v42 = vrot.slane %v1991_v36, %v4416_v48  ;;  %v5160_v36 = vrot.slane %v2604_v26, %v4416_v48 }
 0x1f1   : > { %v5134_v34 = vpop.permute.xlu1 %2387  ;;  %v5136_v55 = vpop.permute.xlu0 %2427  ;;  %v3377_v49 = vcombine.low %v5141_v42, %v5141_v42  ;;  %v3415_v32 = vcombine.low %v5160_v36, %v5160_v36 }
 0x1f2   : > { %5743 = vst [vmem:[#allocation44_spill] sm:$0xff] %v5134_v34  ;;  %5744 = vst [vmem:[#allocation45_spill] sm:$0xff] %v5136_v55 }
 0x1f3   : > { %2139 = vrot.lane.b32.xlu1 %v3496_v63, %s3741_s30  ;;  %1813 = vrot.lane.b32.xlu0 %v3483_v7, %s3737_s10  ;;  %v5173_v63 = vrot.slane %v1783_v59, %v4416_v48 }
 0x1f5   : > { %v5151_v9 = vpop.permute.xlu1 %638  ;;  %v5153_v14 = vpop.permute.xlu0 %678  ;;  %v3370_v19 = vcombine.low %v5173_v63, %v5173_v63 }
 0x1f6   : > { %5746 = vst [vmem:[#allocation46_spill] sm:$0xff] %v5151_v9  ;;  %v5754_v9 = vld [vmem:[#allocation21_spill] sm:$0xff] }
 0x1f7   : > { %2437 = vrot.lane.b32.xlu1 %v3402_v38, %s3739_s19  ;;  %2099 = vrot.lane.b32.xlu0 %v3377_v49, %s3739_s19  ;;  %v3497_v49 = vcombine.high %v2073_v30, %v2073_v30  ;;  %v2775_v47 = vshrl.u32 %v5754_v9, 16 }
 0x1f9   : > { %v5166_v11 = vpop.permute.xlu1 %1592  ;;  %v5168_v20 = vpop.permute.xlu0 %1552 }
 0x1fa   : > { %5747 = vst [vmem:[#allocation47_spill] sm:$0xff] %v5168_v20  ;;  %v5755_v20 = vld [vmem:[#allocation23_spill] sm:$0xff] }
 0x1fb   : > { %2708 = vrot.lane.b32.xlu1 %v3415_v32, %s3738_s29  ;;  %2397 = vrot.lane.b32.xlu0 %v3394_v37, %s3738_s29  ;;  %v3362_v32 = vcombine.low %v1695_v15, %v1695_v15  ;;  %v2780_v3 = vshrl.u32 %v5755_v20, 16 }
 0x1fd   : > { %v5177_v26 = vpop.permute.xlu1 %2432  ;;  %v5179_v7 = vpop.permute.xlu0 %2392 }
 0x1fe   : > { %5748 = vst [vmem:[#allocation48_spill] sm:$0xff] %v5177_v26  ;;  %5749 = vst [vmem:[#allocation49_spill] sm:$0xff] %v5179_v7 }
 0x1ff   : > { %1858 = vrot.lane.b32.xlu1 %v3370_v19, %s3739_s19  ;;  %2668 = vrot.lane.b32.xlu0 %v3507_v21, %s3737_s10  ;;  %v5750_v19 = vcombine.high %v4817_v25, %v4820_v27  ;;  %v5751_v21 = vcombine.high %v4220_v57, %v4223_v58  ;;  %v5752_v57 = vcombine.high %v4683_v24, %v4686_v2 }
 0x201   : > { %v910_v59 = vpop.permute.xlu1 %909  ;;  %v5188_v38 = vpop.permute.xlu0 %944  ;;  %v5204_v30 = vrot.slane %v5750_v19, %v4416_v48  ;;  %v5224_v58 = vrot.slane %v5752_v57, %v4416_v48  ;;  %v5237_v19 = vrot.slane %v1715_v35, %v4416_v48  ;;  %v2793_v35 = vshrl.u32 %v4775_v56, 16 }
 0x203   : > { %2144 = vrot.lane.b32.xlu1 %v3497_v49, %s3742_s22  ;;  %1818 = vrot.lane.b32.xlu0 %v3362_v32, %s3738_s29  ;;  %v2308_v49 = vrot.slane %v5751_v21, %v4416_v48  ;;  %v3416_v25 = vcombine.low %v5204_v30, %v5204_v30  ;;  %v3500_v21 = vcombine.high %v2274_v18, %v2274_v18 }
 0x204   : > { %v2794_v34 = vpack.i.b16 %v2793_v35, %v2792_v0  ;;  %v5757_v35 = vld [vmem:[#allocation19_spill] sm:$0xff] }
 0x205   : > { %v5192_v37 = vpop.permute.xlu1 %954  ;;  %v5194_v7 = vpop.permute.xlu0 %1220  ;;  %v3395_v27 = vcombine.low %v2308_v49, %v2308_v49  ;;  %v2774_v0 = vshrl.u32 %v5757_v35, 16  ;;  %v3501_v17 = vcombine.high %v2308_v49, %v2308_v49 }
 0x206   : > { %v5283_v44 = vrot.slane %v2794_v34, %v4170_v31 }
 0x207   : > { %2442 = vrot.lane.b32.xlu1 %v3504_v6, %s3741_s30  ;;  %2104 = vrot.lane.b32.xlu0 %v3492_v10, %s3741_s30  ;;  %v3408_v10 = vcombine.low %v5224_v58, %v5224_v58 }
 0x209   : > { %v5214_v32 = vpop.permute.xlu1 %1230  ;;  %v5216_v62 = vpop.permute.xlu0 %1185 }
 0x20b   : > { %2713 = vrot.lane.b32.xlu1 %v3416_v25, %s3739_s19  ;;  %2402 = vrot.lane.b32.xlu0 %v3395_v27, %s3739_s19  ;;  %v3363_v25 = vcombine.low %v5237_v19, %v5237_v19  ;;  %v5251_v27 = vrot.slane %v5753_v13, %v4416_v48  ;;  %v2786_v13 = vshrl.u32 %v4719_v4, 16 }
 0x20d   : > { %v5228_v6 = vpop.permute.xlu1 %1195  ;;  %v5230_v8 = vpop.permute.xlu0 %919  ;;  %v3409_v18 = vcombine.low %v5251_v27, %v5251_v27  ;;  %v2788_v46 = vpack.i.b16 %v2787_v53, %v2786_v13  ;;  %v2776_v53 = vpack.i.b16 %v2775_v47, %v2774_v0  ;;  %v5759_v0 = vld [vmem:[#allocation18_spill] sm:$0xff] }
 0x20f   : > { %1863 = vrot.lane.b32.xlu1 %v3488_v60, %s3741_s30  ;;  %2673 = vrot.lane.b32.xlu0 %v3408_v10, %s3738_s29  ;;  %v3493_v10 = vcombine.high %v5141_v42, %v5141_v42  ;;  %v3484_v42 = vcombine.high %v1695_v15, %v1695_v15  ;;  %v2791_v15 = vpack.i.b16 %v4775_v56, %v4756_v33 }
 0x210   : > { %v2779_v33 = vpack.i.b16 %v4758_v12, %v5755_v20 }
 0x211   : > { %v5241_v24 = vpop.permute.xlu1 %1240  ;;  %v5243_v2 = vpop.permute.xlu0 %964 }
 0x212   : > { %v5320_v49 = vrot.slane %v2779_v33, %v4170_v31 }
 0x213   : > { %2407 = vrot.lane.b32.xlu1 %v3500_v21, %s3741_s30  ;;  %1823 = vrot.lane.b32.xlu0 %v3363_v25, %s3739_s19  ;;  %v2781_v21 = vshrl.u32 %v4758_v12, 16  ;;  %v3505_v25 = vcombine.high %v5130_v54, %v5130_v54  ;;  %v3489_v12 = vcombine.high %v5173_v63, %v5173_v63 }
 0x215   : > { %v5256_v57 = vpop.permute.xlu1 %1205  ;;  %v5258_v60 = vpop.permute.xlu0 %929  ;;  %v2782_v39 = vpack.i.b16 %v2781_v21, %v2780_v3  ;;  %v2878_v3 = vrot.slane %v2791_v15, %v4170_v31 }
 0x217   : > { %2678 = vrot.lane.b32.xlu1 %v3409_v18, %s3739_s19  ;;  %2109 = vrot.lane.b32.xlu0 %v3493_v10, %s3742_s22  ;;  %v5756_v18 = vld [vmem:[#allocation20_spill] sm:$0xff]  ;;  %v5297_v56 = vrot.slane %v2782_v39, %v4170_v31  ;;  %v5309_v39 = vrot.slane %v2776_v53, %v4170_v31 }
 0x219   : > { %v905_v26 = vpop.permute.xlu1 %904  ;;  %v940_v55 = vpop.permute.xlu0 %939  ;;  %v2845_v63 = vcombine.low %v5309_v39, %v5297_v56 }
 0x21a   : > { %v973_v10 = vsel %vm680_vm5, %v5756_v18, %v905_v26  ;;  %v3512_v26 = vcombine.high %v5160_v36, %v5160_v36  ;;  %v5758_v36 = vld [vmem:[#allocation24_spill] sm:$0xff]  ;;  %v988_v15 = vsel %vm680_vm5, %v5759_v0, %v940_v55 }
 0x21b   : > { %1828 = vrot.lane.b32.xlu1 %v3484_v42, %s3741_s30  ;;  %2447 = vrot.lane.b32.xlu0 %v3505_v25, %s3742_s22  ;;  %v975_v54 = vsel %vm684_vm6, %v973_v10, %v910_v59  ;;  %v2785_v25 = vpack.i.b16 %v4737_v23, %v4719_v4  ;;  %v5290_v59 = vrot.slane %v2788_v46, %v4170_v31  ;;  %v5760_v55 = vld [vmem:[#allocation12_spill] sm:$0xff] }
 0x21c   : > { %v2773_v4 = vpack.i.b16 %v5754_v9, %v5757_v35  ;;  %v3509_v10 = vcombine.high %v5251_v27, %v5251_v27  ;;  %v990_v33 = vsel %vm684_vm6, %v988_v15, %v5188_v38 }
 0x21d   : > { %v1216_v28 = vpop.permute.xlu1 %1215  ;;  %v950_v45 = vpop.permute.xlu0 %949  ;;  %v2913_v46 = vcombine.low %v5290_v59, %v5283_v44  ;;  %v2870_v34 = vrot.slane %v2785_v25, %v4170_v31  ;;  %v704_v25 = vsel %vm680_vm5, %v5760_v55, %v5007_v61  ;;  %v5762_v61 = vld [vmem:[#allocation25_spill] sm:$0xff] }
 0x21e   : > { %v2802_v35 = vrot.slane %v2773_v4, %v4170_v31  ;;  %v5344_v31 = vrot.slane %v2845_v63, %v4416_v48  ;;  %v706_v38 = vsel %vm684_vm6, %v704_v25, %v5762_v61 }
 0x21f   : > { %2412 = vrot.lane.b32.xlu1 %v3501_v17, %s3742_s22  ;;  %2718 = vrot.lane.b32.xlu0 %v3512_v26, %s3741_s30  ;;  %v3513_v17 = vcombine.high %v5204_v30, %v5204_v30  ;;  %v2879_v21 = vcombine.low %v2870_v34, %v2878_v3  ;;  %v2880_v53 = vcombine.high %v2870_v34, %v2878_v3  ;;  %v5761_v3 = vld [vmem:[#allocation22_spill] sm:$0xff] }
 0x220   : > { %v2811_v27 = vcombine.low %v2802_v35, %v5320_v49  ;;  %v3419_v34 = vcombine.low %v5344_v31, %v5344_v31  ;;  %v3515_v55 = vcombine.high %v5344_v31, %v5344_v31 }
 0x221   : > { %v1181_v23 = vpop.permute.xlu1 %1180  ;;  %v915_v47 = vpop.permute.xlu0 %914 }
 0x222   : > { %v1249_v20 = vsel %vm680_vm5, %v5758_v36, %v1181_v23  ;;  %v977_v9 = vsel %vm687_vm7, %v975_v54, %v915_v47  ;;  %v3508_v54 = vcombine.high %v5224_v58, %v5224_v58  ;;  %v5341_v58 = vrot.slane %v2879_v21, %v4416_v48 }
 0x223   : > { %2723 = vrot.lane.b32.xlu1 %v3513_v17, %s3742_s22  ;;  %1868 = vrot.lane.b32.xlu0 %v3489_v12, %s3742_s22  ;;  %v979_v30 = vsel %vm690_vm8, %v977_v9, %v5230_v8  ;;  %v1251_v42 = vsel %vm684_vm6, %v1249_v20, %v5216_v62  ;;  %v2921_v8 = vrot.slane %v2913_v46, %v4416_v48 }
 0x224   : > { %v1264_v47 = vsel %vm680_vm5, %v5761_v3, %v1216_v28  ;;  %v992_v17 = vsel %vm687_vm7, %v990_v33, %v950_v45  ;;  %v2812_v12 = vcombine.high %v2802_v35, %v5320_v49  ;;  %v5367_v28 = vrot.slane %v2880_v53, %v4416_v48  ;;  %v5763_v45 = vld [vmem:[#allocation14_spill] sm:$0xff] }
 0x225   : > { %v1226_v13 = vpop.permute.xlu1 %1225  ;;  %v1191_v18 = vpop.permute.xlu0 %1190  ;;  %v3426_v23 = vcombine.low %v2921_v8, %v2921_v8  ;;  %v1611_v36 = vsel %vm680_vm5, %v5763_v45, %v5067_v22  ;;  %v1266_v20 = vsel %vm684_vm6, %v1264_v47, %v5194_v7  ;;  %v994_v9 = vsel %vm690_vm8, %v992_v17, %v5192_v37  ;;  %v5764_v22 = vld [vmem:[#allocation26_spill] sm:$0xff] }
 0x226   : > { %v1253_v26 = vsel %vm687_vm7, %v1251_v42, %v1191_v18  ;;  %v3518_v21 = vcombine.high %v5341_v58, %v5341_v58  ;;  %v1268_v42 = vsel %vm687_vm7, %v1266_v20, %v1226_v13  ;;  %v708_v35 = vsel %vm687_vm7, %v706_v38, %v5764_v22  ;;  %v5766_v38 = vld [vmem:[#allocation28_spill] sm:$0xff] }
 0x227   : > { %2688 = vrot.lane.b32.xlu1 %v3509_v10, %s3742_s22  ;;  %2683 = vrot.lane.b32.xlu0 %v3508_v54, %s3741_s30  ;;  %v1255_v62 = vsel %vm690_vm8, %v1253_v26, %v5228_v6  ;;  %v3485_v6 = vcombine.high %v5237_v19, %v5237_v19  ;;  %v5364_v19 = vrot.slane %v2811_v27, %v4416_v48 }
 0x228   : > { %v2914_v13 = vcombine.high %v5290_v59, %v5283_v44  ;;  %v1613_v0 = vsel %vm684_vm6, %v1611_v36, %v5051_v52  ;;  %v1270_v26 = vsel %vm690_vm8, %v1268_v42, %v5214_v32  ;;  %v5765_v52 = vld [vmem:[#allocation31_spill] sm:$0xff] }
 0x229   : > { %v960_v4 = vpop.permute.xlu1 %959  ;;  %v1236_v46 = vpop.permute.xlu0 %1235  ;;  %v3514_v15 = vcombine.high %v5364_v19, %v5364_v19  ;;  %v710_v59 = vsel %vm690_vm8, %v708_v35, %v5765_v52 }
 0x22a   : > { %v996_v18 = vsel %vm693_vm9, %v994_v9, %v960_v4  ;;  %v1272_v27 = vsel %vm693_vm9, %v1270_v26, %v1236_v46  ;;  %v2928_v25 = vrot.slane %v2914_v13, %v4416_v48  ;;  %v3520_v9 = vcombine.high %v5367_v28, %v5367_v28 }
 0x22b   : > { %2969 = vrot.lane.b32.xlu1 %v3426_v23, %s3740_s20  ;;  %1833 = vrot.lane.b32.xlu0 %v3485_v6, %s3742_s22  ;;  %v1274_v46 = vsel %vm696_vm10, %v1272_v27, %v5241_v24 }
 0x22c   : > { %v3430_v17 = vcombine.low %v2928_v25, %v2928_v25 }
 0x22d   : > { %v925_v49 = vpop.permute.xlu1 %924  ;;  %v1201_v63 = vpop.permute.xlu0 %1200 }
 0x22e   : > { %v981_v10 = vsel %vm693_vm9, %v979_v30, %v925_v49  ;;  %v1257_v54 = vsel %vm693_vm9, %v1255_v62, %v1201_v63  ;;  %v2846_v30 = vcombine.high %v5309_v39, %v5297_v56  ;;  %v998_v62 = vsel %vm696_vm10, %v996_v18, %v5243_v2 }
 0x22f   : > { %2974 = vrot.lane.b32.xlu1 %v3518_v21, %s3736_s7  ;;  %2934 = vrot.lane.b32.xlu0 %v3419_v34, %s3740_s20  ;;  %v5388_v7 = vsel %vm696_vm10, %v981_v10, %v5258_v60  ;;  %v5392_v37 = vsel %vm696_vm10, %v1257_v54, %v5256_v57  ;;  %v1615_v60 = vsel %vm687_vm7, %v1613_v0, %v5078_v40 }
 0x230   : > { %v3519_v39 = vcombine.high %v2921_v8, %v2921_v8  ;;  %v1617_v44 = vsel %vm690_vm8, %v1615_v60, %v5090_v41  ;;  %v3429_v2 = vcombine.low %v5367_v28, %v5367_v28  ;;  %v2826_v8 = vrot.slane %v2812_v12, %v4416_v48 }
 0x231   : > { %v970_v57 = vpop.permute.xlu1 %969  ;;  %v5408_v56 = vpop.permute.xlu0 %934  ;;  %v1619_v32 = vsel %vm693_vm9, %v1617_v44, %v5097_v1  ;;  %v712_v1 = vsel %vm693_vm9, %v710_v59, %v4976_v5  ;;  %v2860_v61 = vrot.slane %v2846_v30, %v4416_v48  ;;  %v5767_v48 = vld [vmem:[#allocation29_spill] sm:$0xff]  ;;  %v3521_v10 = vcombine.high %v2928_v25, %v2928_v25  ;;  %v5768_v59 = vld [vmem:[#allocation16_spill] sm:$0xff]  ;;  %v5772_v25 = vld [vmem:[#allocation27_spill] sm:$0xff] }
 0x232   : > { %v1000_v40 = vsel %vm699_vm11, %v998_v62, %v970_v57  ;;  %v1621_v41 = vsel %vm696_vm10, %v1619_v32, %v5118_v50  ;;  %v714_v50 = vsel %vm696_vm10, %v712_v1, %v5103_v29  ;;  %v3422_v12 = vcombine.low %v2826_v8, %v2826_v8  ;;  %v5769_v32 = vld [vmem:[#allocation37_spill] sm:$0xff] }
 0x233   : > { %2979 = vrot.lane.b32.xlu1 %v3519_v39, %s3737_s10  ;;  %2939 = vrot.lane.b32.xlu0 %v3514_v15, %s3736_s7  ;;  %v3034_v53 = vrot.slane %v1000_v40, 6  ;;  %v1623_v33 = vsel %vm699_vm11, %v1621_v41, %v5166_v11  ;;  %v716_v6 = vsel %vm699_vm11, %v714_v50, %v5153_v14  ;;  %v3423_v49 = vcombine.low %v2860_v61, %v2860_v61  ;;  %v5771_v41 = vld [vmem:[#allocation40_spill] sm:$0xff]  ;;  %v5774_v50 = vld [vmem:[#allocation30_spill] sm:$0xff]  ;;  %s3658_s7 = sshll.u32 %s3743_s4, 4  ;;  %s3659_s7 = int_to_ptr.vmem [resolvable:$false] %s3658_s7 }
 0x234   : > { %v3042_v11 = vrot.slane %v1623_v33, 2  ;;  %v3516_v54 = vcombine.high %v2826_v8, %v2826_v8  ;;  %v3517_v30 = vcombine.high %v2860_v61, %v2860_v61  ;;  %v1596_v27 = vsel %vm680_vm5, %v5768_v59, %v5105_v51  ;;  %v5773_v33 = vld [vmem:[#allocation41_spill] sm:$0xff]  ;;  %v5778_v61 = vld [vmem:[#allocation43_spill] sm:$0xff]  ;;  %p3661_p5 = scmp.lt.s32.totalorder %s3177_s17, %s3659_s7 }
 0x235   : > { %v5432_v4 = vpop.permute.xlu1 %1210  ;;  %v1246_v23 = vpop.permute.xlu0 %1245  ;;  %v3059_v24 = vsel %vm3055_vm12, %v716_v6, %v3034_v53  ;;  %v5775_v6 = vld [vmem:[#allocation32_spill] sm:$0xff] }
 0x236   : > { %v1276_v31 = vsel %vm699_vm11, %v1274_v46, %v1246_v23 }
 0x237   : > { %v3038_v5 = vrot.slane %v1276_v31, 4  ;;  %2984 = vrot.lane.b32.xlu1 %v3429_v2, %s3738_s29  ;;  %2944 = vrot.lane.b32.xlu0 %v3515_v55, %s3737_s10  ;;  %v5770_v2 = vld [vmem:[#allocation13_spill] sm:$0xff]  ;;  %s3660_s10 = scalar_lea.vmem %s3659_s7, 256 }
 0x238   : > { %v683_v8 = vsel %vm680_vm5, %v5770_v2, %v5769_v32  ;;  %p3662_p0 = scmp.lt.s32.totalorder %s3660_s10, %s3654_s26 }
 0x239   : > { %v2659_v3 = vpop.permute.xlu1 %2658  ;;  %v2664_v47 = vpop.permute.xlu0 %2663  ;;  %v3064_v29 = vsel %vm3060_vm13, %v3059_v24, %v3038_v5  ;;  %v686_v1 = vsel %vm684_vm6, %v683_v8, %v5772_v25 }
 0x23a   : > { %v2727_v14 = vsel %vm680_vm5, %v5766_v38, %v2659_v3  ;;  %v3070_v34 = vsel %vm3065_vm14, %v3064_v29, %v3042_v11  ;;  %v689_v31 = vsel %vm687_vm7, %v686_v1, %v5774_v50  ;;  %v5776_v11 = vld [vmem:[#allocation42_spill] sm:$0xff]  ;;  %v5777_v3 = vld [vmem:[#allocation33_spill] sm:$0xff]  ;;  %p3663_p6 = por %p3662_p0, %p3661_p5 }
 0x23b   : > { %v5450_v45 = vsel %vm684_vm6, %v2727_v14, %v2664_v47  ;;  %2989 = vrot.lane.b32.xlu1 %v3430_v17, %s3739_s19  ;;  %2949 = vrot.lane.b32.xlu0 %v3422_v12, %s3738_s29  ;;  %v692_v47 = vsel %vm690_vm8, %v689_v31, %v5777_v3  ;;  %v985_v14 = vsel %vm699_vm11, %v5388_v7, %v5408_v56  ;;  %v5783_v31 = vld [vmem:[#allocation36_spill] sm:$0xff]  ;;  %v5785_v3 = vld [vmem:[#allocation39_spill] sm:$0xff] }
 0x23c   : > { %3095 = vmatprep.subr.bf16.mxu0 %v3070_v34  ;;  %v3033_v7 = vrot.slane %v985_v14, 6  ;;  %p3664_p13 = pnand %p3663_p6, %p3657_p4 }
 0x23d   : > { %v2694_v36 = vpop.permute.xlu1 %2693  ;;  %v2699_v20 = vpop.permute.xlu0 %2698 }
 0x23e   : > { %v2742_v63 = vsel %vm680_vm5, %v5767_v48, %v2694_v36  ;;  %v5779_v36 = vld [vmem:[#allocation47_spill] sm:$0xff]  ;;  %v5780_v48 = vld [vmem:[#allocation38_spill] sm:$0xff] }
 0x23f   : > { %v2744_v21 = vsel %vm684_vm6, %v2742_v63, %v2699_v20  ;;  %2994 = vrot.lane.b32.xlu1 %v3520_v9, %s3741_s30  ;;  %2954 = vrot.lane.b32.xlu0 %v3423_v49, %s3739_s19  ;;  %v1261_v9 = vsel %vm699_vm11, %v5392_v37, %v5432_v4  ;;  %v695_v63 = vsel %vm693_vm9, %v692_v47, %v5780_v48 }
 0x241   : > { %v2704_v42 = vpop.permute.xlu1 %2703  ;;  %v2120_v18 = vpop.permute.xlu0 %2119 }
 0x242   : > { %v5462_v22 = vsel %vm687_vm7, %v2744_v21, %v2704_v42  ;;  %v5781_v42 = vld [vmem:[#allocation46_spill] sm:$0xff] }
 0x243   : > { %2999 = vrot.lane.b32.xlu1 %v3521_v10, %s3742_s22  ;;  %2959 = vrot.lane.b32.xlu0 %v3516_v54, %s3741_s30  ;;  %v3037_v54 = vrot.slane %v1261_v9, 4 }
 0x245   : > { %v2085_v28 = vpop.permute.xlu1 %2084  ;;  %v5466_v35 = vpop.permute.xlu0 %1843 }
 0x247   : > { %2964 = vrot.lane.b32.xlu0 %v3517_v30, %s3742_s22 }
 0x249   : > { %v2080_v13 = vpop.permute.xlu1 %2079  ;;  %v2130_v0 = vpop.permute.xlu0 %2129 }
 0x24a   : > { %v2148_v15 = vsel %vm680_vm5, %v4996_v16, %v2080_v13 }
 0x24b   : > { %v2150_v60 = vsel %vm684_vm6, %v2148_v15, %v2085_v28 }
 0x24d   : > { %v1804_v26 = vpop.permute.xlu1 %1803  ;;  %v1809_v57 = vpop.permute.xlu0 %1808 }
 0x24e   : > { %v1872_v62 = vsel %vm680_vm5, %v5057_v43, %v1804_v26  ;;  %v1598_v43 = vsel %vm684_vm6, %v1596_v27, %v5771_v41 }
 0x24f   : > { %v5475_v39 = vsel %vm684_vm6, %v1872_v62, %v1809_v57  ;;  %v1600_v51 = vsel %vm687_vm7, %v1598_v43, %v5773_v33 }
 0x250   : > { %v1602_v24 = vsel %vm690_vm8, %v1600_v51, %v5776_v11  ;;  %v5782_v51 = vld [vmem:[#allocation35_spill] sm:$0xff] }
 0x251   : > { %v2090_v44 = vpop.permute.xlu1 %2089  ;;  %v2095_v52 = vpop.permute.xlu0 %2094  ;;  %v1604_v38 = vsel %vm693_vm9, %v1602_v24, %v5778_v61  ;;  %v5787_v61 = vld [vmem:[#allocation48_spill] sm:$0xff] }
 0x252   : > { %v2152_v40 = vsel %vm687_vm7, %v2150_v60, %v2090_v44  ;;  %v1606_v20 = vsel %vm696_vm10, %v1604_v38, %v5779_v36 }
 0x253   : > { %v5482_v16 = vsel %vm690_vm8, %v2152_v40, %v2095_v52 }
 0x255   : > { %v5489_v53 = vpop.permute.xlu1 %1848  ;;  %v2115_v55 = vpop.permute.xlu0 %2114 }
 0x256   : > { %v2163_v5 = vsel %vm680_vm5, %v5775_v6, %v2115_v55  ;;  %v5784_v6 = vld [vmem:[#allocation15_spill] sm:$0xff] }
 0x257   : > { %v2165_v12 = vsel %vm684_vm6, %v2163_v5, %v2120_v18  ;;  %v698_v18 = vsel %vm696_vm10, %v695_v63, %v5781_v42  ;;  %v2466_v5 = vsel %vm680_vm5, %v5784_v6, %v5783_v31 }
 0x258   : > { %v2468_v47 = vsel %vm684_vm6, %v2466_v5, %v5785_v3 }
 0x259   : > { %v2135_v46 = vpop.permute.xlu1 %2134  ;;  %v1839_v23 = vpop.permute.xlu0 %1838 }
 0x25a   : > { %v1887_v50 = vsel %vm680_vm5, %v5782_v51, %v1839_v23 }
 0x25d   : > { %v1558_v17 = vpop.permute.xlu1 %1557  ;;  %v2125_v29 = vpop.permute.xlu0 %2124 }
 0x25e   : > { %v2167_v34 = vsel %vm687_vm7, %v2165_v12, %v2125_v29  ;;  %v1608_v21 = vsel %vm699_vm11, %v1606_v20, %v1558_v17  ;;  %v5786_v17 = vld [vmem:[#allocation45_spill] sm:$0xff]  ;;  %v1889_v29 = vsel %vm684_vm6, %v1887_v50, %v5466_v35 }
 0x25f   : > { %v2169_v49 = vsel %vm690_vm8, %v2167_v34, %v2130_v0  ;;  %v3041_v30 = vrot.slane %v1608_v21, 2  ;;  %v2470_v12 = vsel %vm687_vm7, %v2468_v47, %v5786_v17  ;;  %v1891_v9 = vsel %vm687_vm7, %v1889_v29, %v5489_v53 }
 0x260   : > { %v2472_v38 = vsel %vm690_vm8, %v2470_v12, %v5787_v61  ;;  %v2171_v23 = vsel %vm693_vm9, %v2169_v49, %v2135_v46 }
 0x261   : > { %v1854_v56 = vpop.permute.xlu1 %1853  ;;  %v644_v10 = vpop.permute.xlu0 %643 }
 0x262   : > { %v701_v28 = vsel %vm699_vm11, %v698_v18, %v644_v10  ;;  %v1893_v35 = vsel %vm690_vm8, %v1891_v9, %v1854_v56  ;;  %v5788_v18 = vld [vmem:[#allocation34_spill] sm:$0xff] }
 0x263   : > { %v3057_v13 = vsel %vm3055_vm12, %v701_v28, %v3033_v7  ;;  %v5789_v7 = vld [vmem:[#allocation17_spill] sm:$0xff] }
 0x264   : > { %v3062_v37 = vsel %vm3060_vm13, %v3057_v13, %v3037_v54  ;;  %v2451_v10 = vsel %vm680_vm5, %v5789_v7, %v5788_v18  ;;  %v5790_v13 = vld [vmem:[#allocation44_spill] sm:$0xff] }
 0x265   : > { %v2140_v4 = vpop.permute.xlu1 %2139  ;;  %v5524_v0 = vpop.permute.xlu0 %1813  ;;  %v3067_v15 = vsel %vm3065_vm14, %v3062_v37, %v3041_v30 }
 0x266   : > { %3096 = vmatpush1.bf16.msra.mxu0 %v3067_v15  ;;  %v2173_v14 = vsel %vm696_vm10, %v2171_v23, %v2140_v4 }
 0x269   : > { %v2438_v60 = vpop.permute.xlu1 %2437  ;;  %v2100_v26 = vpop.permute.xlu0 %2099 }
 0x26a   : > { %v2474_v34 = vsel %vm693_vm9, %v2472_v38, %v2438_v60  ;;  %v5791_v60 = vld [vmem:[#allocation49_spill] sm:$0xff] }
 0x26d   : > { %v2709_v57 = vpop.permute.xlu1 %2708  ;;  %v2398_v62 = vpop.permute.xlu0 %2397 }
 0x26e   : > { %v2748_v21 = vsel %vm690_vm8, %v5462_v22, %v2709_v57  ;;  %v2453_v22 = vsel %vm684_vm6, %v2451_v10, %v5790_v13 }
 0x26f   : > { %v2455_v57 = vsel %vm687_vm7, %v2453_v22, %v5791_v60 }
 0x271   : > { %v1859_v44 = vpop.permute.xlu1 %1858  ;;  %v2669_v52 = vpop.permute.xlu0 %2668 }
 0x272   : > { %v1895_v49 = vsel %vm693_vm9, %v1893_v35, %v1859_v44  ;;  %v2731_v44 = vsel %vm687_vm7, %v5450_v45, %v2669_v52 }
 0x275   : > { %v2145_v59 = vpop.permute.xlu1 %2144  ;;  %v1819_v27 = vpop.permute.xlu0 %1818 }
 0x276   : > { %v2175_v48 = vsel %vm699_vm11, %v2173_v14, %v2145_v59 }
 0x277   : > { %v3046_v53 = vrot.slane %v2175_v48, 6 }
 0x279   : > { %v2443_v40 = vpop.permute.xlu1 %2442  ;;  %v2105_v32 = vpop.permute.xlu0 %2104 }
 0x27a   : > { %v2476_v63 = vsel %vm696_vm10, %v2474_v34, %v2443_v40 }
 0x27d   : > { %v2714_v2 = vpop.permute.xlu1 %2713  ;;  %v2403_v8 = vpop.permute.xlu0 %2402 }
 0x27e   : > { %v2750_v42 = vsel %vm693_vm9, %v2748_v21, %v2714_v2  ;;  %v2156_v2 = vsel %vm693_vm9, %v5482_v16, %v2100_v26  ;;  %v1876_v16 = vsel %vm687_vm7, %v5475_v39, %v5524_v0 }
 0x27f   : > { %v2158_v31 = vsel %vm696_vm10, %v2156_v2, %v2105_v32  ;;  %v1878_v32 = vsel %vm690_vm8, %v1876_v16, %v1819_v27 }
 0x281   : > { %v1864_v41 = vpop.permute.xlu1 %1863  ;;  %v2674_v43 = vpop.permute.xlu0 %2673 }
 0x282   : > { %v1897_v54 = vsel %vm696_vm10, %v1895_v49, %v1864_v41  ;;  %v2457_v41 = vsel %vm690_vm8, %v2455_v57, %v2398_v62  ;;  %v2733_v51 = vsel %vm690_vm8, %v2731_v44, %v2674_v43 }
 0x283   : > { %v2459_v6 = vsel %vm693_vm9, %v2457_v41, %v2403_v8 }
 0x285   : > { %v2408_v55 = vpop.permute.xlu1 %2407  ;;  %v1824_v25 = vpop.permute.xlu0 %1823 }
 0x286   : > { %v2461_v26 = vsel %vm696_vm10, %v2459_v6, %v2408_v55 }
 0x289   : > { %v2679_v1 = vpop.permute.xlu1 %2678  ;;  %v2110_v33 = vpop.permute.xlu0 %2109 }
 0x28a   : > { %v2735_v5 = vsel %vm693_vm9, %v2733_v51, %v2679_v1  ;;  %v2160_v62 = vsel %vm699_vm11, %v2158_v31, %v2110_v33  ;;  %v1880_v1 = vsel %vm693_vm9, %v1878_v32, %v1824_v25 }
 0x28b   : > { %v3045_v47 = vrot.slane %v2160_v62, 6 }
 0x28d   : > { %v1829_v11 = vpop.permute.xlu1 %1828  ;;  %v2448_v24 = vpop.permute.xlu0 %2447 }
 0x28e   : > { %v2478_v46 = vsel %vm699_vm11, %v2476_v63, %v2448_v24  ;;  %v1882_v17 = vsel %vm696_vm10, %v1880_v1, %v1829_v11 }
 0x28f   : > { %v3050_v37 = vrot.slane %v2478_v46, 4 }
 0x291   : > { %v2413_v36 = vpop.permute.xlu1 %2412  ;;  %v2719_v20 = vpop.permute.xlu0 %2718 }
 0x292   : > { %v2752_v28 = vsel %vm696_vm10, %v2750_v42, %v2719_v20  ;;  %v2463_v8 = vsel %vm699_vm11, %v2461_v26, %v2413_v36 }
 0x293   : > { %v3049_v0 = vrot.slane %v2463_v8, 4 }
 0x295   : > { %v2724_v30 = vpop.permute.xlu1 %2723  ;;  %v1869_v56 = vpop.permute.xlu0 %1868 }
 0x296   : > { %v2754_v4 = vsel %vm699_vm11, %v2752_v28, %v2724_v30  ;;  %v1899_v15 = vsel %vm699_vm11, %v1897_v54, %v1869_v56 }
 0x297   : > { %v3054_v59 = vrot.slane %v2754_v4, 2  ;;  %v3075_v40 = vsel %vm3055_vm12, %v1899_v15, %v3046_v53 }
 0x298   : > { %v3079_v50 = vsel %vm3060_vm13, %v3075_v40, %v3050_v37  ;;  %v3086_v37 = vld [vmem:[#allocation6] sm:$0xf] }
 0x299   : > { %v2689_v24 = vpop.permute.xlu1 %2688  ;;  %v2684_v45 = vpop.permute.xlu0 %2683  ;;  %v3084_v52 = vsel %vm3065_vm14, %v3079_v50, %v3054_v59 }
 0x29a   : > { %v2737_v43 = vsel %vm696_vm10, %v2735_v5, %v2684_v45  ;;  %3097 = vmatprep.subr.bf16.mxu0 %v3084_v52 }
 0x29b   : > { %v2739_v3 = vsel %vm699_vm11, %v2737_v43, %v2689_v24 }
 0x29c   : > { %v3053_v33 = vrot.slane %v2739_v3, 2 }
 0x29d   : > { %v2970_v12 = vpop.permute.xlu1 %2969  ;;  %v1834_v39 = vpop.permute.xlu0 %1833 }
 0x29e   : > { %v1884_v55 = vsel %vm699_vm11, %v1882_v17, %v1834_v39  ;;  %v3018_v9 = vsel %vm680_vm5, %v5341_v58, %v2970_v12 }
 0x29f   : > { %v3073_v29 = vsel %vm3055_vm12, %v1884_v55, %v3045_v47 }
 0x2a0   : > { %v3077_v61 = vsel %vm3060_vm13, %v3073_v29, %v3049_v0 }
 0x2a1   : > { %v2975_v27 = vpop.permute.xlu1 %2974  ;;  %v2935_v38 = vpop.permute.xlu0 %2934  ;;  %v3081_v23 = vsel %vm3065_vm14, %v3077_v61, %v3053_v33 }
 0x2a2   : > { %3098 = vmatpush1.bf16.msra.mxu0 %v3081_v23  ;;  %v3020_v48 = vsel %vm684_vm6, %v3018_v9, %v2975_v27  ;;  %v3003_v49 = vsel %vm680_vm5, %v5364_v19, %v2935_v38 }
 0x2a5   : > { %v2980_v25 = vpop.permute.xlu1 %2979  ;;  %v2940_v14 = vpop.permute.xlu0 %2939 }
 0x2a6   : > { %v3022_v21 = vsel %vm687_vm7, %v3020_v48, %v2980_v25  ;;  %v3005_v18 = vsel %vm684_vm6, %v3003_v49, %v2940_v14 }
 0x2a9   : > { %v2985_v34 = vpop.permute.xlu1 %2984  ;;  %v2945_v36 = vpop.permute.xlu0 %2944 }
 0x2aa   : > { %v3024_v46 = vsel %vm690_vm8, %v3022_v21, %v2985_v34  ;;  %v3007_v53 = vsel %vm687_vm7, %v3005_v18, %v2945_v36 }
 0x2ad   : > { %v2990_v11 = vpop.permute.xlu1 %2989  ;;  %v2950_v20 = vpop.permute.xlu0 %2949 }
 0x2ae   : > { %v3026_v42 = vsel %vm693_vm9, %v3024_v46, %v2990_v11  ;;  %v3009_v28 = vsel %vm690_vm8, %v3007_v53, %v2950_v20 }
 0x2b1   : > { %v2995_v63 = vpop.permute.xlu1 %2994  ;;  %v2955_v35 = vpop.permute.xlu0 %2954 }
 0x2b2   : > { %v3028_v7 = vsel %vm696_vm10, %v3026_v42, %v2995_v63  ;;  %v3011_v30 = vsel %vm693_vm9, %v3009_v28, %v2955_v35 }
 0x2b5   : > { %v3000_v10 = vpop.permute.xlu1 %2999  ;;  %v2960_v58 = vpop.permute.xlu0 %2959 }
 0x2b6   : > { %v3030_v54 = vsel %vm699_vm11, %v3028_v7, %v3000_v10  ;;  %v3013_v19 = vsel %vm696_vm10, %v3011_v30, %v2960_v58 }
 0x2b7   : > { %3433 = vmatprep.subr.msk.bf16.mxu0 %vm3055_vm12, %v3030_v54 }
 0x2b9   : > { %v2965_v56 = vpop.permute.xlu0 %2964 }
 0x2ba   : > { %v3015_v13 = vsel %vm699_vm11, %v3013_v19, %v2965_v56 }
 0x2bb   : > { %v3091_v22 = vsel %vm3055_vm12, %v3015_v13, 0 }
 0x2bc   : > { %3100 = vmatpush1.bf16.msra.mxu0 %v3091_v22 }
 0x2bf   : > { %3434 = vmatmul.mubr.msk.bf16.vlgmr.msra.gmra.mrb[0].mxu0 %vm3087_vm15, %v3086_v37 }
 0x392   : > { %v3129_v4 = vpop.f32.mrb[0].mxu0 }
 0x393   : > { %v3148_v15 = vmul.f32 %v3129_v4, %v3129_v4  ;;  %v3131_v60 = vpop.f32.mrb[1].mxu0 }
 0x394   : > { %v3522_v57 = vpack.c.bf16 %v3131_v60, %v3129_v4  ;;  %v3145_v44 = vadd.f32 %v3131_v60, %v3129_v4  ;;  %v3149_v59 = vmul.f32 %v3131_v60, %v3131_v60  ;;  %v3133_v40 = vpop.f32.mrb[2].mxu0 }
 0x395   : > { %v3134_v2 = vpop.f32.mrb[3].mxu0 }
 0x396   : > { %3146 = vadd.xlane.f32.xlu0 %v3145_v44  ;;  %v3150_v41 = vadd.f32 %v3149_v59, %v3148_v15  ;;  %3144 = vst [vmem:[%s202_s6] sm:$0xff] %v3522_v57 }
 0x398   : > { %3151 = vadd.xlane.f32.xlu1 %v3150_v41 }
 0x399   : > { %3667 = shalt.err (!%p3664_p13)
}
 0x39a   : > { %s3668_s11 = scalar_lea.hbm %s5614_s5, 128  ;;  %s3672_s20 = scalar_lea.hbm %s5659_s2, 256 }
 0x39b   : > { %p3669_p7 = scmp.ne.s32.totalorder %s5614_s5, %s3668_s11  ;;  %p3673_p1 = scmp.lt.u32.totalorder %s5614_s5, %s5659_s2 }
 0x39c   : > { %p3674_p11 = scmp.lt.u32.totalorder %s3672_s20, %s3668_s11  ;;  %p3676_p9 = scmp.lt.u32.totalorder %s3668_s11, %s5614_s5 }
 0x39d   : > { %p3670_p3 = pnand %p3669_p7, %p5792_p10 }
 0x39e   : > { %p3675_p8 = por %p3674_p11, %p3673_p1 }
 0x39f   : > { %p3671_p12 = pneg %p3670_p3 }
 0x3a0   : > { %p3677_p2 = por %p3676_p9, %p3675_p8 }
 0x3a2   : > { %p3678_p4 = pnand %p3677_p2, %p3671_p12 }
 0x3a4   : > { %3681 = shalt.err (!%p3678_p4)
}
 0x3a5   : > { %3530 = dma.vmem_to_hbm [thread:$0]  (%p5792_p10), %s3177_s17, 128, %s5614_s5, %s3158_s23   ;;  %vm3153_vm0 = vcmask 7168   ;;  %vm3155_vm1 = vcmask 15360  }
 0x3a6   : > { %p209_p5 = scmp.lt.s32.totalorder %s3785_s16, 1 }
 0x3a8   : > { %s5800_s16 = smov (!%p209_p5, %s3785_s16), 1 }
 0x3a9   : > { %s3294_s27 = sshll.u32 %s5800_s16, 3 }
 0x3aa   : > { %s212_s9 = scalar_lea.vmem %s5660_s3, %s3294_s27 }
 0x423   : > { %v3147_v51 = vpop.xlane.xlu0 %3146 }
 0x425   : > { %v3152_v50 = vpop.xlane.xlu1 %3151 }
 0x426   : > { %v3154_v31 = vsel %vm3153_vm0, %v3147_v51, %v3152_v50 }
 0x427   : > { %3156 = vst.msk [vmem:[%s212_s9] sm:$0xff] %vm3155_vm1, %v3154_v31 }
 0x428 PF: > { %s3191_s24 = sand.u32 1, %s3712_s12   ;;  %p5793_p0 = scmp.ne.s32.totalorder %s5686_s25, 0 }
 0x429   : > { %p5794_p10 = scmp.ge.s32.totalorder %s3724_s15, 2  ;;  %s3192_s28 = scalar_lea.sflag [#allocation5], %s3191_s24 }
 0x42b   : > { %p3541_p6 = pnand %p5794_p10, %p5793_p0 }
 0x42d   : > { %3707 = dma.done.wait (!%p3541_p6), %s3192_s28, 128  }
 0x42e   : > { %3709 = vsyncadd (!%p3541_p6), %s3192_s28, 4294967168  ;;  %p18_p13 = scmp.ge.s32.totalorder %s3789_s18, 4   ;;  %s5795_s12 = smov %s3716_s13 }
 0x42f   : > { %s5796_s13 = smov %s3720_s14  ;;  %s5797_s14 = smov %s3801_s21 }
 0x430   : > { %s5798_s15 = smov %s3789_s18  ;;  %20 = sbr.rel (!%p18_p13) target bundleno = 6 (0x6), region = 89 }
 0x437   :  { %3204 = vsyncpa [#allocation4], 1 }
 0x438   :  { %3206 = vsyncpa [#allocation4 + $0x1], 1 }
 0x439   :  { %3207 = vsyncpa [#allocation7], 1 }
 0x43a   :  { %3208 = vsyncpa [#allocation5], 1 }
 0x43b   :  { %3210 = vsyncpa [#allocation5 + $0x1], 1 }

</bundles_post_ra>
